<compile_context>
chip_gen: v5e
topology: v5e:2x2
jax: 0.10.0
libtpu: 0.0.40
codegen_flags: <defaults>
</compile_context>

<pallas_src>
import jax
import jax.numpy as jnp
from jax.experimental import pallas as pl
from jax.experimental.pallas import tpu as pltpu


def _round_up(x, m):
    return ((x + m - 1) // m) * m


def fused_recommend_kernel(uid_ref, iid_ref, a1_ref, b1_ref, w2_ref, b2_ref,
                           w3_ref, b3_ref, out_ref):
    tb = out_ref.shape[1]
    n_rows = a1_ref.shape[1]                  # U + I

    uids = uid_ref[...]                       # (1, TB) int32, lane-dense
    iids = iid_ref[...]                       # (1, TB) int32, already offset by U

    # Fused gather + concat + Linear(2E->512): one MXU matmul against a
    # "two-hot" selector (item ids are offset by num_users in the wrapper).
    rows = jax.lax.broadcasted_iota(jnp.int32, (n_rows, tb), 0)
    twohot = ((rows == uids) | (rows == iids)).astype(jnp.float32)   # (U+I, TB)

    h1 = jnp.dot(a1_ref[...], twohot,
                 preferred_element_type=jnp.float32) + b1_ref[...]   # (H1, TB)
    h1 = jnp.maximum(h1, 0.0)
    # TODO(synk): training-mode dropout not implemented (eval: identity).

    # Linear(512 -> 256) + ReLU
    h2 = jnp.dot(w2_ref[...], h1,
                 preferred_element_type=jnp.float32) + b2_ref[...]   # (H2, TB)
    h2 = jnp.maximum(h2, 0.0)

    # Linear(256 -> 1): VPU multiply + sublane reduce, lane-dense (1, TB) out.
    out = jnp.sum(h2 * w3_ref[...], axis=0, keepdims=True) + b3_ref[...]
    out_ref[...] = out.astype(out_ref.dtype)


def recommendation_forward(user_ids, item_ids, params, *, batch_tile=512):
    """Forward pass of RecommendationModel (eval-mode dropout = identity)."""
    tab_u = params["user_embeddings"]                 # (U, E) f32
    tab_i = params["item_embeddings"]                 # (I, E) f32
    U, E = tab_u.shape
    I = tab_i.shape[0]
    w1 = params["w1"]                                 # (2E, H1)
    H1 = w1.shape[1]
    w2 = params["w2"]                                 # (H1, H2)
    H2 = w2.shape[1]

    B = user_ids.shape[0]

    # Tile sizing: big tiles amortize the ~0.35 us per-grid-step overhead;
    # don't over-pad tiny batches, and prefer >= 2 tiles (v7x megacore) when
    # the batch is large enough to split.
    bt = max(128, min(batch_tile, _round_up(B, 128)))
    if B > 128 and pl.cdiv(B, bt) < 2:
        bt = max(128, _round_up(pl.cdiv(B, 2), 128))
    num_tiles = pl.cdiv(B, bt)
    b_pad = num_tiles * bt

    def pad_ids(ids, offset=0):
        ids = ids.astype(jnp.int32) + offset
        padded = jnp.full((b_pad,), -1, jnp.int32).at[:B].set(ids)
        return padded.reshape(1, b_pad)               # lane-dense (1, b_pad)

    uid = pad_ids(user_ids)
    iid = pad_ids(item_ids, offset=U)                 # offset into combined table

    # One-time layout plumbing (XLA, not per grid step): fold W1 into the
    # embedding tables so gather + concat + layer-1 become a single matmul.
    w1u = w1[:E].T                                    # (H1, E)
    w1i = w1[E:].T                                    # (H1, E)
    a1 = jnp.concatenate([w1u @ tab_u.T, w1i @ tab_i.T], axis=1)   # (H1, U+I)
    b1 = params["b1"].reshape(H1, 1).astype(jnp.float32)
    w2t = w2.T.astype(jnp.float32)                    # (H2, H1)
    b2 = params["b2"].reshape(H2, 1).astype(jnp.float32)
    w3 = params["w3"].reshape(H2, 1).astype(jnp.float32)
    b3 = params["b3"].reshape(1, 1).astype(jnp.float32)

    args = (uid, iid, a1, b1, w2t, b2, w3, b3)

    def resident(a):
        nd = a.ndim
        return pl.BlockSpec(a.shape, lambda i, _nd=nd: (0,) * _nd)

    tile_spec = pl.BlockSpec((1, bt), lambda i: (0, i))

    # Cost / VMEM bookkeeping.
    flops = 2 * b_pad * ((U + I) * H1 + H1 * H2 + H2)
    bytes_accessed = sum(int(a.size) * a.dtype.itemsize for a in args) + b_pad * 4
    resident_bytes = sum(int(a.size) * a.dtype.itemsize for a in args[2:])
    tile_bytes = 4 * bt * ((U + I) + 2 * H1 + 2 * H2 + 4)
    vmem_limit = int(min(64 << 20,
                         max(16 << 20, 2 * resident_bytes + 2 * tile_bytes + (4 << 20))))

    out = pl.pallas_call(
        fused_recommend_kernel,
        out_shape=jax.ShapeDtypeStruct((1, b_pad), jnp.float32),
        grid=(num_tiles,),
        in_specs=[tile_spec, tile_spec] + [resident(a) for a in args[2:]],
        out_specs=tile_spec,
        compiler_params=pltpu.CompilerParams(
            dimension_semantics=("parallel",),
            vmem_limit_bytes=vmem_limit,
        ),
        cost_estimate=pl.CostEstimate(
            flops=flops, transcendentals=0, bytes_accessed=bytes_accessed),
    )(*args)

    # Drop padded rows; equivalent of .squeeze(1) in the PyTorch forward.
    return out[0, :B]


def init_params(key, num_users, num_items, embedding_dim, h1=512, h2=256):
    ks = jax.random.split(key, 8)
    d = embedding_dim * 2

    def lin_init(k, fan_in, shape):
        bound = 1.0 / jnp.sqrt(fan_in)
        return jax.random.uniform(k, shape, jnp.float32, -bound, bound)

    return {
        # nn.init.normal_(std=0.01) on both embedding tables
        "user_embeddings": 0.01 * jax.random.normal(
            ks[0], (num_users, embedding_dim), jnp.float32),
        "item_embeddings": 0.01 * jax.random.normal(
            ks[1], (num_items, embedding_dim), jnp.float32),
        # Linear params stored as (in, out) weights / 1-D biases; the forward
        # does the (one-time) transposition / folding into kernel layouts.
        "w1": lin_init(ks[2], d, (d, h1)),
        "b1": lin_init(ks[3], d, (h1,)),
        "w2": lin_init(ks[4], h1, (h1, h2)),
        "b2": lin_init(ks[5], h1, (h2,)),
        "w3": lin_init(ks[6], h2, (h2,)),
        "b3": lin_init(ks[7], h2, (1,)),
    }


if __name__ == "__main__":
    key = jax.random.PRNGKey(0)
    num_users, num_items, embedding_dim = 64, 128, 32
    batch = 8

    pkey, ukey, ikey = jax.random.split(key, 3)
    params = init_params(pkey, num_users, num_items, embedding_dim)

    user_ids = jax.random.randint(ukey, (batch,), 0, num_users, dtype=jnp.int32)
    item_ids = jax.random.randint(ikey, (batch,), 0, num_items, dtype=jnp.int32)

    scores = jax.jit(recommendation_forward)(user_ids, item_ids, params)
    jax.block_until_ready(scores)

    # Reference check in plain JAX (f32 everywhere, eval-mode dropout).
    ue = params["user_embeddings"][user_ids]                       # (B, E)
    ie = params["item_embeddings"][item_ids]                       # (B, E)
    x = jnp.concatenate([ue, ie], axis=1)                          # (B, 2E)
    h1 = jnp.maximum(x @ params["w1"] + params["b1"], 0.0)
    h2 = jnp.maximum(h1 @ params["w2"] + params["b2"], 0.0)
    ref = h2 @ params["w3"] + params["b3"]                         # (B,)

    assert scores.shape == (batch,)
    assert jnp.allclose(scores, ref, atol=1e-4, rtol=1e-4), (scores, ref)

    print("KERNEL_OK")
</pallas_src>

<mosaic_0001>
module attributes {stable_mosaic.version = 11 : i64} {
  func.func @fused_recommend_kernel(%arg0: i32, %arg1: memref<1x128xi32, #tpu.memory_space<vmem>>, %arg2: memref<1x128xi32, #tpu.memory_space<vmem>>, %arg3: memref<512x192xf32, #tpu.memory_space<vmem>>, %arg4: memref<512x1xf32, #tpu.memory_space<vmem>>, %arg5: memref<256x512xf32, #tpu.memory_space<vmem>>, %arg6: memref<256x1xf32, #tpu.memory_space<vmem>>, %arg7: memref<256x1xf32, #tpu.memory_space<vmem>>, %arg8: memref<1x1xf32, #tpu.memory_space<vmem>>, %arg9: memref<1x128xf32, #tpu.memory_space<vmem>>) attributes {dimension_semantics = [#tpu.dimension_semantics<parallel>], iteration_bounds = array<i64: 1>, scalar_prefetch = 0 : i64, scratch_operands = 0 : i64, tpu.core_type = #tpu.core_type<tc>, window_params = [{transform_indices = @transform_0, window_bounds = array<i64: 1, 128>}, {transform_indices = @transform_1, window_bounds = array<i64: 1, 128>}, {pipeline_mode = #tpu.pipeline_mode<synchronous>, transform_indices = @transform_2, window_bounds = array<i64: 512, 192>}, {pipeline_mode = #tpu.pipeline_mode<synchronous>, transform_indices = @transform_3, window_bounds = array<i64: 512, 1>}, {pipeline_mode = #tpu.pipeline_mode<synchronous>, transform_indices = @transform_4, window_bounds = array<i64: 256, 512>}, {pipeline_mode = #tpu.pipeline_mode<synchronous>, transform_indices = @transform_5, window_bounds = array<i64: 256, 1>}, {pipeline_mode = #tpu.pipeline_mode<synchronous>, transform_indices = @transform_6, window_bounds = array<i64: 256, 1>}, {pipeline_mode = #tpu.pipeline_mode<synchronous>, transform_indices = @transform_7, window_bounds = array<i64: 1, 1>}, {transform_indices = @transform_8, window_bounds = array<i64: 1, 128>}]} {
    %c0 = arith.constant 0 : index
    %c0_0 = arith.constant 0 : index
    %0 = vector.load %arg1[%c0, %c0_0] : memref<1x128xi32, #tpu.memory_space<vmem>>, vector<1x128xi32>
    %c0_1 = arith.constant 0 : index
    %c0_2 = arith.constant 0 : index
    %1 = vector.load %arg2[%c0_1, %c0_2] : memref<1x128xi32, #tpu.memory_space<vmem>>, vector<1x128xi32>
    %2 = tpu.iota {dimensions = array<i32: 0>} : vector<192x128xi32>
    %3 = vector.broadcast %0 : vector<1x128xi32> to vector<192x128xi32>
    %4 = arith.cmpi eq, %2, %3 : vector<192x128xi32>
    %5 = vector.broadcast %1 : vector<1x128xi32> to vector<192x128xi32>
    %6 = arith.cmpi eq, %2, %5 : vector<192x128xi32>
    %7 = arith.ori %4, %6 : vector<192x128xi1>
    %8 = arith.extui %7 : vector<192x128xi1> to vector<192x128xi32>
    %9 = arith.sitofp %8 : vector<192x128xi32> to vector<192x128xf32>
    %c0_3 = arith.constant 0 : index
    %c0_4 = arith.constant 0 : index
    %10 = vector.load %arg3[%c0_3, %c0_4] : memref<512x192xf32, #tpu.memory_space<vmem>>, vector<512x192xf32>
    %cst = arith.constant dense<0.000000e+00> : vector<512x128xf32>
    %11 = tpu.matmul %10, %9, %cst {dimension_numbers = #tpu.dot_dimension_numbers<[1], [0], [0], [1], [0, 0, 1, 1], [], []>} : vector<512x192xf32>, vector<192x128xf32>, vector<512x128xf32> -> vector<512x128xf32>
    %c0_5 = arith.constant 0 : index
    %c0_6 = arith.constant 0 : index
    %12 = vector.load %arg4[%c0_5, %c0_6] : memref<512x1xf32, #tpu.memory_space<vmem>>, vector<512x1xf32>
    %13 = vector.broadcast %12 : vector<512x1xf32> to vector<512x128xf32>
    %14 = arith.addf %11, %13 : vector<512x128xf32>
    %cst_7 = arith.constant 0.000000e+00 : f32
    %15 = vector.broadcast %cst_7 : f32 to vector<512x128xf32>
    %16 = arith.maximumf %14, %15 : vector<512x128xf32>
    %c0_8 = arith.constant 0 : index
    %c0_9 = arith.constant 0 : index
    %17 = vector.load %arg5[%c0_8, %c0_9] : memref<256x512xf32, #tpu.memory_space<vmem>>, vector<256x512xf32>
    %cst_10 = arith.constant dense<0.000000e+00> : vector<256x128xf32>
    %18 = tpu.matmul %17, %16, %cst_10 {dimension_numbers = #tpu.dot_dimension_numbers<[1], [0], [0], [1], [0, 0, 1, 1], [], []>} : vector<256x512xf32>, vector<512x128xf32>, vector<256x128xf32> -> vector<256x128xf32>
    %c0_11 = arith.constant 0 : index
    %c0_12 = arith.constant 0 : index
    %19 = vector.load %arg6[%c0_11, %c0_12] : memref<256x1xf32, #tpu.memory_space<vmem>>, vector<256x1xf32>
    %20 = vector.broadcast %19 : vector<256x1xf32> to vector<256x128xf32>
    %21 = arith.addf %18, %20 : vector<256x128xf32>
    %cst_13 = arith.constant 0.000000e+00 : f32
    %22 = vector.broadcast %cst_13 : f32 to vector<256x128xf32>
    %23 = arith.maximumf %21, %22 : vector<256x128xf32>
    %c0_14 = arith.constant 0 : index
    %c0_15 = arith.constant 0 : index
    %24 = vector.load %arg7[%c0_14, %c0_15] : memref<256x1xf32, #tpu.memory_space<vmem>>, vector<256x1xf32>
    %25 = vector.broadcast %24 : vector<256x1xf32> to vector<256x128xf32>
    %26 = arith.mulf %23, %25 : vector<256x128xf32>
    %cst_16 = arith.constant dense<0.000000e+00> : vector<128xf32>
    %27 = vector.multi_reduction <add>, %26, %cst_16 [0] : vector<256x128xf32> to vector<128xf32>
    %28 = vector.shape_cast %27 : vector<128xf32> to vector<1x128xf32>
    %c0_17 = arith.constant 0 : index
    %c0_18 = arith.constant 0 : index
    %29 = vector.load %arg8[%c0_17, %c0_18] : memref<1x1xf32, #tpu.memory_space<vmem>>, vector<1x1xf32>
    %30 = vector.broadcast %29 : vector<1x1xf32> to vector<1x128xf32>
    %31 = arith.addf %28, %30 : vector<1x128xf32>
    %c0_19 = arith.constant 0 : index
    %c0_20 = arith.constant 0 : index
    %32 = vector.load %arg9[%c0_19, %c0_20] : memref<1x128xf32, #tpu.memory_space<vmem>>, vector<1x128xf32>
    tpu.vector_store %arg9[%c0_19, %c0_20], %31 {strides = array<i32>} : memref<1x128xf32, #tpu.memory_space<vmem>>, vector<1x128xf32>,
    return
  }
  func.func @transform_0(%arg0: i32) -> (i32, i32) {
    %c0_i32 = arith.constant 0 : i32
    %c0_i32_0 = arith.constant 0 : i32
    return %c0_i32, %arg0 : i32, i32
  }
  func.func @transform_1(%arg0: i32) -> (i32, i32) {
    %c0_i32 = arith.constant 0 : i32
    %c0_i32_0 = arith.constant 0 : i32
    return %c0_i32, %arg0 : i32, i32
  }
  func.func @transform_2(%arg0: i32) -> (i32, i32) {
    %c0_i32 = arith.constant 0 : i32
    %c0_i32_0 = arith.constant 0 : i32
    %c0_i32_1 = arith.constant 0 : i32
    return %c0_i32, %c0_i32_0 : i32, i32
  }
  func.func @transform_3(%arg0: i32) -> (i32, i32) {
    %c0_i32 = arith.constant 0 : i32
    %c0_i32_0 = arith.constant 0 : i32
    %c0_i32_1 = arith.constant 0 : i32
    return %c0_i32, %c0_i32_0 : i32, i32
  }
  func.func @transform_4(%arg0: i32) -> (i32, i32) {
    %c0_i32 = arith.constant 0 : i32
    %c0_i32_0 = arith.constant 0 : i32
    %c0_i32_1 = arith.constant 0 : i32
    return %c0_i32, %c0_i32_0 : i32, i32
  }
  func.func @transform_5(%arg0: i32) -> (i32, i32) {
    %c0_i32 = arith.constant 0 : i32
    %c0_i32_0 = arith.constant 0 : i32
    %c0_i32_1 = arith.constant 0 : i32
    return %c0_i32, %c0_i32_0 : i32, i32
  }
  func.func @transform_6(%arg0: i32) -> (i32, i32) {
    %c0_i32 = arith.constant 0 : i32
    %c0_i32_0 = arith.constant 0 : i32
    %c0_i32_1 = arith.constant 0 : i32
    return %c0_i32, %c0_i32_0 : i32, i32
  }
  func.func @transform_7(%arg0: i32) -> (i32, i32) {
    %c0_i32 = arith.constant 0 : i32
    %c0_i32_0 = arith.constant 0 : i32
    %c0_i32_1 = arith.constant 0 : i32
    return %c0_i32, %c0_i32_0 : i32, i32
  }
  func.func @transform_8(%arg0: i32) -> (i32, i32) {
    %c0_i32 = arith.constant 0 : i32
    %c0_i32_0 = arith.constant 0 : i32
    return %c0_i32, %arg0 : i32, i32
  }
}

</mosaic_0001>

<bundles_post_ra>
// kernel: recommendation_forward.1
= control target key start
LH: loop header
LB: loop body
LE: loop exit
PB: predicated region body
PF: predicated region fallthrough
CT: control target
= control target key end

     0   :  { %v33_v0 = vlaneseq  ;;  %v2564_v2 = vmov 0   ;;  %v2565_v13 = vmov 1.0   ;;  %s4640_s0 = inlined_call_operand.vmem [shape: s32[1,128], index: 0, kind: input, shape index: {}]   ;;  %s4641_s1 = inlined_call_operand.vmem [shape: s32[1,128], index: 1, kind: input, shape index: {}]   ;;  %s4642_s3 = inlined_call_operand.vmem [shape: f32[512,1], index: 3, kind: input, shape index: {}]   ;;  %s4643_s2 = inlined_call_operand.vmem [shape: f32[512,192], index: 2, kind: input, shape index: {}]   ;;  %s4644_s5 = inlined_call_operand.vmem [shape: f32[256,1], index: 5, kind: input, shape index: {}]   ;;  %s4645_s6 = inlined_call_operand.vmem [shape: f32[256,1], index: 6, kind: input, shape index: {}]   ;;  %s4646_s7 = inlined_call_operand.<no memory space> [shape: f32[1,1], index: 7, kind: input, shape index: {}]   ;;  %s4647_s4 = inlined_call_operand.vmem [shape: f32[256,512], index: 4, kind: input, shape index: {}]   ;;  %s4648_s8 = inlined_call_operand.vmem [shape: f32[1,128], index: 8, kind: output, shape index: {}]  }
   0x1   :  { %v2614_v1 = vld [vmem:[%s4640_s0] ss:$0 sm:$0xff]  ;;  %2560 = vset.pattern.permute.xlu1 %v2564_v2  ;;  %2559 = vset.pattern.permute.xlu0 %v2564_v2  ;;  %v310_v5 = vld [vmem:[%s4642_s3 + $0x10] sm:$0xff]  ;;  %v311_v15 = vld [vmem:[%s4642_s3 + $0x18] sm:$0xff] }
   0x2   :  { %v2616_v3 = vshrl.u32 %v33_v0, 7  ;;  %v2621_v4 = vld [vmem:[%s4641_s1] ss:$0 sm:$0xff]  ;;  %2561 = vset.pattern.permute.xlu2 %v2564_v2  ;;  %384 = vperm.xlu1 %2560, %v310_v5   ;;  %v309_v16 = vld [vmem:[%s4642_s3 + $0x8] sm:$0xff]  ;;  %v323_v27 = vld [vmem:[%s4642_s3 + $0x78] sm:$0xff] }
   0x3   :  { %v308_v6 = vld [vmem:[%s4642_s3] sm:$0xff]  ;;  %v313_v21 = vld [vmem:[%s4642_s3 + $0x28] sm:$0xff]  ;;  %v314_v31 = vld [vmem:[%s4642_s3 + $0x30] sm:$0xff] }
   0x4   :  { %374 = vperm.xlu0 %2559, %v308_v6   ;;  %v49_v7 = vadd.s32 120, %v2616_v3  ;;  %v48_v8 = vadd.s32 112, %v2616_v3  ;;  %v47_v9 = vadd.s32 104, %v2616_v3  ;;  %v46_v10 = vadd.s32 96, %v2616_v3  ;;  %v312_v12 = vld [vmem:[%s4642_s3 + $0x20] sm:$0xff]  ;;  %v322_v35 = vld [vmem:[%s4642_s3 + $0x70] sm:$0xff] }
   0x5   :  { %v45_v11 = vadd.s32 88, %v2616_v3  ;;  %394 = vperm.xlu2 %2561, %v312_v12   ;;  %v44_v14 = vadd.s32 80, %v2616_v3  ;;  %v43_v17 = vadd.s32 72, %v2616_v3  ;;  %v57_v18 = vadd.s32 184, %v2616_v3  ;;  %v321_v42 = vld [vmem:[%s4642_s3 + $0x68] sm:$0xff]  ;;  %v339_v45 = vld [vmem:[%s4642_s3 + $0xf8] sm:$0xff] }
   0x6   :  { %vm74_vm0 = vcmp.eq.s32.totalorder %v49_v7, %v2614_v1  ;;  %vm99_vm1 = vcmp.eq.s32.totalorder %v49_v7, %v2621_v4  ;;  %vm73_vm2 = vcmp.eq.s32.totalorder %v48_v8, %v2614_v1  ;;  %vm98_vm3 = vcmp.eq.s32.totalorder %v48_v8, %v2621_v4  ;;  %v338_v47 = vld [vmem:[%s4642_s3 + $0xf0] sm:$0xff]  ;;  %v181_v48 = vld [vmem:[%s4643_s2 + $0x8] sm:$0xff]  ;;  %v320_v50 = vld [vmem:[%s4642_s3 + $0x60] sm:$0xff] }
   0x7   :  { %vm123_vm4 = vmor %vm74_vm0, %vm99_vm1  ;;  %vm72_vm5 = vcmp.eq.s32.totalorder %v47_v9, %v2614_v1  ;;  %vm97_vm6 = vcmp.eq.s32.totalorder %v47_v9, %v2621_v4  ;;  %vm71_vm8 = vcmp.eq.s32.totalorder %v46_v10, %v2614_v1  ;;  %vm96_vm9 = vcmp.eq.s32.totalorder %v46_v10, %v2621_v4  ;;  %v337_v49 = vld [vmem:[%s4642_s3 + $0xe8] sm:$0xff]  ;;  %v180_v51 = vld [vmem:[%s4643_s2] sm:$0xff] }
   0x8   :  { %2469 = vmatpush.msk.msra.mxu0 %vm123_vm4, %v2565_v13  ;;  %vm122_vm7 = vmor %vm73_vm2, %vm98_vm3  ;;  %vm70_vm11 = vcmp.eq.s32.totalorder %v45_v11, %v2614_v1  ;;  %vm95_vm12 = vcmp.eq.s32.totalorder %v45_v11, %v2621_v4  ;;  %v42_v19 = vadd.s32 64, %v2616_v3  ;;  %vm69_vm14 = vcmp.eq.s32.totalorder %v44_v14, %v2614_v1  ;;  %v319_v52 = vld [vmem:[%s4642_s3 + $0x58] sm:$0xff]  ;;  %v318_v54 = vld [vmem:[%s4642_s3 + $0x50] sm:$0xff] }
   0x9   :  { %vm121_vm10 = vmor %vm72_vm5, %vm97_vm6  ;;  %vm94_vm15 = vcmp.eq.s32.totalorder %v44_v14, %v2621_v4  ;;  %v56_v20 = vadd.s32 176, %v2616_v3  ;;  %vm68_vm1 = vcmp.eq.s32.totalorder %v43_v17, %v2614_v1  ;;  %vm93_vm2 = vcmp.eq.s32.totalorder %v43_v17, %v2621_v4  ;;  %v183_v53 = vld [vmem:[%s4643_s2 + $0x18] sm:$0xff]  ;;  %v336_v55 = vld [vmem:[%s4642_s3 + $0xe0] sm:$0xff] }
   0xa   :  { %2470 = vmatpush.msk.msra.mxu0 %vm122_vm7, %v2565_v13  ;;  %vm120_vm13 = vmor %vm71_vm8, %vm96_vm9  ;;  %389 = vperm.xlu1 %2560, %v311_v15   ;;  %v41_v22 = vadd.s32 56, %v2616_v3  ;;  %vm82_vm3 = vcmp.eq.s32.totalorder %v57_v18, %v2614_v1  ;;  %vm107_vm4 = vcmp.eq.s32.totalorder %v57_v18, %v2621_v4  ;;  %v55_v23 = vadd.s32 168, %v2616_v3  ;;  %v182_v56 = vld [vmem:[%s4643_s2 + $0x10] sm:$0xff]  ;;  %v335_v57 = vld [vmem:[%s4642_s3 + $0xd8] sm:$0xff] }
   0xb   :  { %vm119_vm0 = vmor %vm70_vm11, %vm95_vm12  ;;  %vm67_vm6 = vcmp.eq.s32.totalorder %v42_v19, %v2614_v1  ;;  %vm92_vm7 = vcmp.eq.s32.totalorder %v42_v19, %v2621_v4  ;;  %v40_v24 = vadd.s32 48, %v2616_v3  ;;  %vm81_vm9 = vcmp.eq.s32.totalorder %v56_v20, %v2614_v1  ;;  %v185_v58 = vld [vmem:[%s4643_s2 + $0x28] sm:$0xff]  ;;  %v334_v59 = vld [vmem:[%s4642_s3 + $0xd0] sm:$0xff] }
   0xc   :  { %379 = vperm.xlu0 %2559, %v309_v16   ;;  %2471 = vmatpush.msk.msra.mxu0 %vm121_vm10, %v2565_v13  ;;  %vm118_vm5 = vmor %vm69_vm14, %vm94_vm15  ;;  %vm106_vm10 = vcmp.eq.s32.totalorder %v56_v20, %v2621_v4  ;;  %v54_v26 = vadd.s32 160, %v2616_v3  ;;  %vm66_vm11 = vcmp.eq.s32.totalorder %v41_v22, %v2614_v1  ;;  %vm91_vm12 = vcmp.eq.s32.totalorder %v41_v22, %v2621_v4  ;;  %v317_v60 = vld [vmem:[%s4642_s3 + $0x48] sm:$0xff]  ;;  %v184_v61 = vld [vmem:[%s4643_s2 + $0x20] sm:$0xff] }
   0xd   :  { %399 = vperm.xlu2 %2561, %v313_v21   ;;  %vm2677_vm8 = vmor %vm68_vm1, %vm93_vm2  ;;  %v39_v28 = vadd.s32 40, %v2616_v3  ;;  %vm80_vm15 = vcmp.eq.s32.totalorder %v55_v23, %v2614_v1  ;;  %v53_v30 = vadd.s32 152, %v2616_v3  ;;  %vm65_vm1 = vcmp.eq.s32.totalorder %v40_v24, %v2614_v1  ;;  %v316_v62 = vld [vmem:[%s4642_s3 + $0x40] sm:$0xff]  ;;  %v187_v63 = vld [vmem:[%s4643_s2 + $0x38] sm:$0xff] }
   0xe   :  { %2472 = vmatpush.msk.msra.mxu0 %vm120_vm13, %v2565_v13  ;;  %vm131_vm13 = vmor %vm82_vm3, %vm107_vm4  ;;  %vm90_vm2 = vcmp.eq.s32.totalorder %v40_v24, %v2621_v4  ;;  %v38_v32 = vadd.s32 32, %v2616_v3  ;;  %v52_v34 = vadd.s32 144, %v2616_v3  ;;  %v37_v36 = vadd.s32 24, %v2616_v3  ;;  %v315_v0 = vld [vmem:[%s4642_s3 + $0x38] sm:$0xff]  ;;  %v186_v2 = vld [vmem:[%s4643_s2 + $0x30] sm:$0xff] }
   0xf   :  { %vm2697_vm14 = vmor %vm67_vm6, %vm92_vm7  ;;  %2485 = vmatpush.msk.msra.mxu1 %vm131_vm13, %v2565_v13  ;;  %vm104_vm6 = vcmp.eq.s32.totalorder %v54_v26, %v2621_v4  ;;  %vm64_vm7 = vcmp.eq.s32.totalorder %v39_v28, %v2614_v1  ;;  %v51_v38 = vadd.s32 136, %v2616_v3  ;;  %v50_v39 = vadd.s32 128, %v2616_v3  ;;  %v330_v5 = vld [vmem:[%s4642_s3 + $0xb0] sm:$0xff]  ;;  %v331_v6 = vld [vmem:[%s4642_s3 + $0xb8] sm:$0xff] }
  0x10   :  { %2473 = vmatpush.msk.msra.mxu0 %vm119_vm0, %v2565_v13  ;;  %vm105_vm0 = vcmp.eq.s32.totalorder %v55_v23, %v2621_v4  ;;  %vm130_vm3 = vmor %vm81_vm9, %vm106_vm10  ;;  %vm63_vm13 = vcmp.eq.s32.totalorder %v38_v32, %v2614_v1  ;;  %v36_v41 = vadd.s32 16, %v2616_v3  ;;  %v35_v44 = vadd.s32 8, %v2616_v3  ;;  %v188_v7 = vld [vmem:[%s4643_s2 + $0x40] sm:$0xff]  ;;  %v329_v8 = vld [vmem:[%s4642_s3 + $0xa8] sm:$0xff] }
  0x11   :  { %vm2722_vm4 = vmor %vm66_vm11, %vm91_vm12  ;;  %2486 = vmatpush.msk.msra.mxu1 %vm130_vm3, %v2565_v13  ;;  %vm78_vm11 = vcmp.eq.s32.totalorder %v53_v30, %v2614_v1  ;;  %vm103_vm12 = vcmp.eq.s32.totalorder %v53_v30, %v2621_v4  ;;  %vm62_vm3 = vcmp.eq.s32.totalorder %v37_v36, %v2614_v1  ;;  %v191_v9 = vld [vmem:[%s4643_s2 + $0x58] sm:$0xff]  ;;  %v328_v11 = vld [vmem:[%s4642_s3 + $0xa0] sm:$0xff] }
  0x12   :  { %2474 = vmatpush.msk.msra.mxu0 %vm118_vm5, %v2565_v13  ;;  %449 = vperm.xlu1 %2560, %v323_v27   ;;  %vm79_vm5 = vcmp.eq.s32.totalorder %v54_v26, %v2614_v1  ;;  %vm129_vm9 = vmor %vm80_vm15, %vm105_vm0  ;;  %v327_v10 = vld [vmem:[%s4642_s3 + $0x98] sm:$0xff]  ;;  %v190_v12 = vld [vmem:[%s4643_s2 + $0x50] sm:$0xff] }
  0x13   :  { %vm2747_vm10 = vmor %vm65_vm1, %vm90_vm2  ;;  %2487 = vmatpush.msk.msra.mxu1 %vm129_vm9, %v2565_v13  ;;  %vm77_vm1 = vcmp.eq.s32.totalorder %v52_v34, %v2614_v1  ;;  %vm102_vm2 = vcmp.eq.s32.totalorder %v52_v34, %v2621_v4  ;;  %v193_v14 = vld [vmem:[%s4643_s2 + $0x68] sm:$0xff]  ;;  %v324_v15 = vld [vmem:[%s4642_s3 + $0x80] sm:$0xff] }
  0x14   :  { %2475 = vmatpush.msk.msra.mxu0 %vm2677_vm8, %v2565_v13  ;;  %vm89_vm8 = vcmp.eq.s32.totalorder %v39_v28, %v2621_v4  ;;  %404 = vperm.xlu0 %2559, %v314_v31   ;;  %vm128_vm15 = vmor %vm79_vm5, %vm104_vm6  ;;  %v325_v16 = vld [vmem:[%s4642_s3 + $0x88] sm:$0xff]  ;;  %v192_v17 = vld [vmem:[%s4643_s2 + $0x60] sm:$0xff] }
  0x15   :  { %444 = vperm.xlu2 %2561, %v322_v35   ;;  %vm2769_vm0 = vmor %vm64_vm7, %vm89_vm8  ;;  %2488 = vmatpush.msk.msra.mxu1 %vm128_vm15, %v2565_v13  ;;  %vm76_vm7 = vcmp.eq.s32.totalorder %v51_v38, %v2614_v1  ;;  %vm101_vm8 = vcmp.eq.s32.totalorder %v51_v38, %v2621_v4  ;;  %v340_v18 = vld [vmem:[%s4642_s3 + $0x100] sm:$0xff]  ;;  %v195_v19 = vld [vmem:[%s4643_s2 + $0x78] sm:$0xff] }
  0x16   :  { %2476 = vmatpush.msk.msra.mxu0 %vm2697_vm14, %v2565_v13  ;;  %vm88_vm14 = vcmp.eq.s32.totalorder %v38_v32, %v2621_v4  ;;  %vm127_vm5 = vmor %vm78_vm11, %vm103_vm12  ;;  %vm100_vm11 = vcmp.eq.s32.totalorder %v50_v39, %v2621_v4  ;;  %v342_v20 = vld [vmem:[%s4642_s3 + $0x110] sm:$0xff]  ;;  %v341_v21 = vld [vmem:[%s4642_s3 + $0x108] sm:$0xff] }
  0x17   :  { %vm2793_vm6 = vmor %vm63_vm13, %vm88_vm14  ;;  %2489 = vmatpush.msk.msra.mxu1 %vm127_vm5, %v2565_v13  ;;  %vm61_vm13 = vcmp.eq.s32.totalorder %v36_v41, %v2614_v1  ;;  %vm86_vm14 = vcmp.eq.s32.totalorder %v36_v41, %v2621_v4  ;;  %vm59_vm5 = vcmp.eq.s32.totalorder %v2616_v3, %v2614_v1  ;;  %v194_v22 = vld [vmem:[%s4643_s2 + $0x70] sm:$0xff]  ;;  %v343_v23 = vld [vmem:[%s4642_s3 + $0x118] sm:$0xff] }
  0x18   :  { %2477 = vmatpush.msk.msra.mxu0 %vm2722_vm4, %v2565_v13  ;;  %vm87_vm4 = vcmp.eq.s32.totalorder %v37_v36, %v2621_v4  ;;  %vm126_vm9 = vmor %vm77_vm1, %vm102_vm2  ;;  %vm85_vm1 = vcmp.eq.s32.totalorder %v35_v44, %v2621_v4  ;;  %v197_v24 = vld [vmem:[%s4643_s2 + $0x88] sm:$0xff]  ;;  %v344_v26 = vld [vmem:[%s4642_s3 + $0x120] sm:$0xff] }
  0x19   :  { %vm2811_vm12 = vmor %vm62_vm3, %vm87_vm4  ;;  %2490 = vmatpush.msk.msra.mxu1 %vm126_vm9, %v2565_v13  ;;  %vm692_vm3 = vcmask 523264   ;;  %v345_v25 = vld [vmem:[%s4642_s3 + $0x128] sm:$0xff]  ;;  %v196_v27 = vld [vmem:[%s4643_s2 + $0x80] sm:$0xff] }
  0x1a   :  { %2478 = vmatpush.msk.msra.mxu0 %vm2747_vm10, %v2565_v13  ;;  %vm75_vm10 = vcmp.eq.s32.totalorder %v50_v39, %v2614_v1  ;;  %439 = vperm.xlu1 %2560, %v321_v42   ;;  %vm125_vm15 = vmor %vm76_vm7, %vm101_vm8  ;;  %v346_v28 = vld [vmem:[%s4642_s3 + $0x130] sm:$0xff]  ;;  %v199_v29 = vld [vmem:[%s4643_s2 + $0x98] sm:$0xff] }
  0x1b   :  { %2491 = vmatpush.msk.msra.mxu1 %vm125_vm15, %v2565_v13  ;;  %vm124_vm2 = vmor %vm75_vm10, %vm100_vm11  ;;  %v348_v30 = vld [vmem:[%s4642_s3 + $0x140] sm:$0xff]  ;;  %v347_v31 = vld [vmem:[%s4642_s3 + $0x138] sm:$0xff] }
  0x1c   :  { %2479 = vmatpush.msk.msra.mxu0 %vm2769_vm0, %v2565_v13  ;;  %529 = vperm.xlu0 %2559, %v339_v45   ;;  %vm60_vm0 = vcmp.eq.s32.totalorder %v35_v44, %v2614_v1  ;;  %vm110_vm4 = vmor %vm61_vm13, %vm86_vm14  ;;  %v333_v1 = vld [vmem:[%s4642_s3 + $0xc8] sm:$0xff]  ;;  %v198_v32 = vld [vmem:[%s4643_s2 + $0x90] sm:$0xff] }
  0x1d   :  { %524 = vperm.xlu2 %2561, %v338_v47   ;;  %2492 = vmatpush.msk.msra.mxu1 %vm124_vm2, %v2565_v13  ;;  %vm109_vm7 = vmor %vm60_vm0, %vm85_vm1  ;;  %v349_v33 = vld [vmem:[%s4642_s3 + $0x148] sm:$0xff]  ;;  %v351_v35 = vld [vmem:[%s4642_s3 + $0x158] sm:$0xff] }
  0x1e   :  { %2480 = vmatpush.msk.msra.mxu0 %vm2793_vm6, %v2565_v13  ;;  %vm84_vm6 = vcmp.eq.s32.totalorder %v2616_v3, %v2621_v4  ;;  %2493 = vmatmul.msk.f32.vlgmr.msra.gmra.mxu1 %vm692_vm3, %v181_v48  ;;  %v332_v3 = vld [vmem:[%s4642_s3 + $0xc0] sm:$0xff]  ;;  %v189_v4 = vld [vmem:[%s4643_s2 + $0x48] sm:$0xff]  ;;  %v350_v36 = vld [vmem:[%s4642_s3 + $0x150] sm:$0xff] }
  0x1f   :  { %vm108_vm8 = vmor %vm59_vm5, %vm84_vm6  ;;  %v201_v34 = vld [vmem:[%s4643_s2 + $0xa8] sm:$0xff]  ;;  %v200_v37 = vld [vmem:[%s4643_s2 + $0xa0] sm:$0xff] }
  0x20   :  { %2481 = vmatpush.msk.msra.mxu0 %vm2811_vm12, %v2565_v13  ;;  %v352_v38 = vld [vmem:[%s4642_s3 + $0x160] sm:$0xff]  ;;  %v203_v39 = vld [vmem:[%s4643_s2 + $0xb8] sm:$0xff]  ;;  %v354_v40 = vld [vmem:[%s4642_s3 + $0x170] sm:$0xff] }
  0x21   :  { %v353_v41 = vld [vmem:[%s4642_s3 + $0x168] sm:$0xff]  ;;  %v202_v42 = vld [vmem:[%s4643_s2 + $0xb0] sm:$0xff]  ;;  %v355_v43 = vld [vmem:[%s4642_s3 + $0x178] sm:$0xff] }
  0x22   :  { %2482 = vmatpush.msk.msra.mxu0 %vm110_vm4, %v2565_v13  ;;  %519 = vperm.xlu1 %2560, %v337_v49   ;;  %v205_v44 = vld [vmem:[%s4643_s2 + $0xc8] sm:$0xff]  ;;  %v356_v46 = vld [vmem:[%s4642_s3 + $0x180] sm:$0xff]  ;;  %v371_v48 = vld [vmem:[%s4642_s3 + $0x1f8] sm:$0xff] }
  0x23   :  { %v357_v45 = vld [vmem:[%s4642_s3 + $0x188] sm:$0xff]  ;;  %v204_v47 = vld [vmem:[%s4643_s2 + $0xc0] sm:$0xff]  ;;  %v207_v49 = vld [vmem:[%s4643_s2 + $0xd8] sm:$0xff] }
  0x24   :  { %2483 = vmatpush.msk.msra.mxu0 %vm109_vm7, %v2565_v13  ;;  %434 = vperm.xlu0 %2559, %v320_v50   ;;  %v369_v50 = vld [vmem:[%s4642_s3 + $0x1e8] sm:$0xff] }
  0x25   :  { %429 = vperm.xlu2 %2561, %v319_v52   ;;  %v206_v52 = vld [vmem:[%s4643_s2 + $0xd0] sm:$0xff] }
  0x26   :  { %2484 = vmatpush.msk.msra.mxu0 %vm108_vm8, %v2565_v13  ;;  %2494 = vmatmul.msk.f32.gmra.mxu1 %vm692_vm3, %v183_v53  ;;  %v326_v13 = vld [vmem:[%s4642_s3 + $0x90] sm:$0xff]  ;;  %v368_v53 = vld [vmem:[%s4642_s3 + $0x1e0] sm:$0xff] }
  0x27   :  { %901 = vmatmul.f32.vlgmr.msra.gmra.mxu0 %v180_v51  ;;  %v370_v51 = vld [vmem:[%s4642_s3 + $0x1f0] sm:$0xff] }
  0x2a   :  { %424 = vperm.xlu1 %2560, %v318_v54   ;;  %v209_v54 = vld [vmem:[%s4643_s2 + $0xe8] sm:$0xff] }
  0x2c   :  { %514 = vperm.xlu0 %2559, %v336_v55   ;;  %v366_v55 = vld [vmem:[%s4642_s3 + $0x1d0] sm:$0xff] }
  0x2d   :  { %509 = vperm.xlu2 %2561, %v335_v57   ;;  %v208_v57 = vld [vmem:[%s4643_s2 + $0xe0] sm:$0xff] }
  0x2e   :  { %2495 = vmatmul.msk.f32.gmra.mxu1 %vm692_vm3, %v185_v58  ;;  %v365_v58 = vld [vmem:[%s4642_s3 + $0x1c8] sm:$0xff] }
  0x2f   :  { %904 = vmatmul.f32.gmra.mxu0 %v182_v56  ;;  %v367_v56 = vld [vmem:[%s4642_s3 + $0x1d8] sm:$0xff] }
  0x32   :  { %504 = vperm.xlu1 %2560, %v334_v59   ;;  %v211_v59 = vld [vmem:[%s4643_s2 + $0xf8] sm:$0xff] }
  0x34   :  { %419 = vperm.xlu0 %2559, %v317_v60   ;;  %v363_v60 = vld [vmem:[%s4642_s3 + $0x1b8] sm:$0xff] }
  0x35   :  { %414 = vperm.xlu2 %2561, %v316_v62   ;;  %v210_v62 = vld [vmem:[%s4643_s2 + $0xf0] sm:$0xff] }
  0x36   :  { %2496 = vmatmul.msk.f32.gmra.mxu1 %vm692_vm3, %v187_v63  ;;  %v362_v63 = vld [vmem:[%s4642_s3 + $0x1b0] sm:$0xff] }
  0x37   :  { %907 = vmatmul.f32.gmra.mxu0 %v184_v61  ;;  %v364_v61 = vld [vmem:[%s4642_s3 + $0x1c0] sm:$0xff] }
  0x3a   :  { %409 = vperm.xlu1 %2560, %v315_v0  }
  0x3c   :  { %499 = vperm.xlu0 %2559, %v333_v1   ;;  %v213_v1 = vld [vmem:[%s4643_s2 + $0x108] sm:$0xff] }
  0x3d   :  { %494 = vperm.xlu2 %2561, %v332_v3   ;;  %v361_v3 = vld [vmem:[%s4642_s3 + $0x1a8] sm:$0xff] }
  0x3e   :  { %2497 = vmatmul.msk.f32.gmra.mxu1 %vm692_vm3, %v189_v4 }
  0x3f   :  { %910 = vmatmul.f32.gmra.mxu0 %v186_v2  ;;  %v360_v2 = vld [vmem:[%s4642_s3 + $0x1a0] sm:$0xff] }
  0x42   :  { %484 = vperm.xlu1 %2560, %v330_v5  }
  0x44   :  { %489 = vperm.xlu0 %2559, %v331_v6   ;;  %v212_v6 = vld [vmem:[%s4643_s2 + $0x100] sm:$0xff] }
  0x45   :  { %479 = vperm.xlu2 %2561, %v329_v8  }
  0x46   :  { %2498 = vmatmul.msk.f32.gmra.mxu1 %vm692_vm3, %v191_v9 }
  0x47   :  { %913 = vmatmul.f32.gmra.mxu0 %v188_v7  ;;  %v359_v7 = vld [vmem:[%s4642_s3 + $0x198] sm:$0xff] }
  0x4a   :  { %469 = vperm.xlu1 %2560, %v327_v10   ;;  %v215_v10 = vld [vmem:[%s4643_s2 + $0x118] sm:$0xff] }
  0x4c   :  { %474 = vperm.xlu0 %2559, %v328_v11  }
  0x4d   :  { %464 = vperm.xlu2 %2561, %v326_v13   ;;  %v1495_v13 = vld [vmem:[%s4644_s5] sm:$0xff] }
  0x4e   :  { %2499 = vmatmul.msk.f32.gmra.mxu1 %vm692_vm3, %v193_v14  ;;  %v358_v14 = vld [vmem:[%s4642_s3 + $0x190] sm:$0xff] }
  0x4f   :  { %916 = vmatmul.f32.gmra.mxu0 %v190_v12 }
  0x52   :  { %454 = vperm.xlu1 %2560, %v324_v15  }
  0x54   :  { %459 = vperm.xlu0 %2559, %v325_v16   ;;  %v214_v16 = vld [vmem:[%s4643_s2 + $0x110] sm:$0xff] }
  0x55   :  { %534 = vperm.xlu2 %2561, %v340_v18  }
  0x56   :  { %2500 = vmatmul.msk.f32.gmra.mxu1 %vm692_vm3, %v195_v19  ;;  %v217_v19 = vld [vmem:[%s4643_s2 + $0x128] sm:$0xff] }
  0x57   :  { %919 = vmatmul.f32.gmra.mxu0 %v192_v17  ;;  %v1496_v17 = vld [vmem:[%s4644_s5 + $0x8] sm:$0xff] }
  0x5a   :  { %544 = vperm.xlu1 %2560, %v342_v20   ;;  %v1498_v20 = vld [vmem:[%s4644_s5 + $0x18] sm:$0xff] }
  0x5c   :  { %539 = vperm.xlu0 %2559, %v341_v21  }
  0x5d   :  { %549 = vperm.xlu2 %2561, %v343_v23  }
  0x5e   :  { %2501 = vmatmul.msk.f32.gmra.mxu1 %vm692_vm3, %v197_v24 }
  0x5f   :  { %922 = vmatmul.f32.gmra.mxu0 %v194_v22  ;;  %v3121_v12 = vpop.permute.xlu2 %394  ;;  %v1497_v22 = vld [vmem:[%s4644_s5 + $0x10] sm:$0xff] }
  0x62   :  { %559 = vperm.xlu1 %2560, %v345_v25   ;;  %v216_v25 = vld [vmem:[%s4643_s2 + $0x120] sm:$0xff] }
  0x64   :  { %554 = vperm.xlu0 %2559, %v344_v26   ;;  %v1499_v26 = vld [vmem:[%s4644_s5 + $0x20] sm:$0xff] }
  0x65   :  { %564 = vperm.xlu2 %2561, %v346_v28  }
  0x66   :  { %2502 = vmatmul.msk.f32.gmra.mxu1 %vm692_vm3, %v199_v29  ;;  %v219_v29 = vld [vmem:[%s4643_s2 + $0x138] sm:$0xff] }
  0x67   :  { %925 = vmatmul.f32.gmra.mxu0 %v196_v27  ;;  %v3145_v21 = vpop.permute.xlu2 %399 }
  0x6a   :  { %574 = vperm.xlu1 %2560, %v348_v30  }
  0x6c   :  { %569 = vperm.xlu0 %2559, %v347_v31   ;;  %v1501_v31 = vld [vmem:[%s4644_s5 + $0x30] sm:$0xff] }
  0x6d   :  { %579 = vperm.xlu2 %2561, %v349_v33  }
  0x6e   :  { %2503 = vmatmul.msk.f32.gmra.mxu1 %vm692_vm3, %v201_v34  ;;  %v218_v34 = vld [vmem:[%s4643_s2 + $0x130] sm:$0xff] }
  0x6f   :  { %928 = vmatmul.f32.gmra.mxu0 %v198_v32  ;;  %v1500_v32 = vld [vmem:[%s4644_s5 + $0x28] sm:$0xff] }
  0x72   :  { %589 = vperm.xlu1 %2560, %v351_v35   ;;  %v3175_v35 = vpop.permute.xlu2 %444 }
  0x74   :  { %584 = vperm.xlu0 %2559, %v350_v36   ;;  %v385_v23 = vpop.permute.xlu1 %384  ;;  %v1502_v36 = vld [vmem:[%s4644_s5 + $0x38] sm:$0xff] }
  0x75   :  { %594 = vperm.xlu2 %2561, %v352_v38   ;;  %v221_v38 = vld [vmem:[%s4643_s2 + $0x148] sm:$0xff] }
  0x76   :  { %2504 = vmatmul.msk.f32.gmra.mxu1 %vm692_vm3, %v203_v39  ;;  %v375_v4 = vpop.permute.xlu0 %374  ;;  %v1504_v39 = vld [vmem:[%s4644_s5 + $0x48] sm:$0xff] }
  0x77   :  { %931 = vmatmul.f32.gmra.mxu0 %v200_v37 }
  0x7a   :  { %604 = vperm.xlu1 %2560, %v354_v40   ;;  %v1503_v40 = vld [vmem:[%s4644_s5 + $0x40] sm:$0xff] }
  0x7c   :  { %599 = vperm.xlu0 %2559, %v353_v41  }
  0x7d   :  { %609 = vperm.xlu2 %2561, %v355_v43   ;;  %v1505_v43 = vld [vmem:[%s4644_s5 + $0x50] sm:$0xff] }
  0x7e   :  { %2505 = vmatmul.msk.f32.gmra.mxu1 %vm692_vm3, %v205_v44  ;;  %v3200_v44 = vpop.permute.xlu2 %524 }
  0x7f   :  { %934 = vmatmul.f32.gmra.mxu0 %v202_v42  ;;  %v220_v42 = vld [vmem:[%s4643_s2 + $0x140] sm:$0xff] }
  0x82   :  { %619 = vperm.xlu1 %2560, %v357_v45  }
  0x84   :  { %614 = vperm.xlu0 %2559, %v356_v46   ;;  %v223_v46 = vld [vmem:[%s4643_s2 + $0x158] sm:$0xff] }
  0x85   :  { %689 = vperm.xlu2 %2561, %v371_v48   ;;  %v1506_v48 = vld [vmem:[%s4644_s5 + $0x58] sm:$0xff] }
  0x86   :  { %2506 = vmatmul.msk.f32.gmra.mxu1 %vm692_vm3, %v207_v49 }
  0x87   :  { %937 = vmatmul.f32.gmra.mxu0 %v204_v47  ;;  %v1507_v47 = vld [vmem:[%s4644_s5 + $0x60] sm:$0xff] }
  0x8a   :  { %679 = vperm.xlu1 %2560, %v369_v50   ;;  %v222_v50 = vld [vmem:[%s4643_s2 + $0x150] sm:$0xff] }
  0x8c   :  { %684 = vperm.xlu0 %2559, %v370_v51   ;;  %v1508_v51 = vld [vmem:[%s4644_s5 + $0x68] sm:$0xff] }
  0x8d   :  { %674 = vperm.xlu2 %2561, %v368_v53   ;;  %v225_v53 = vld [vmem:[%s4643_s2 + $0x168] sm:$0xff] }
  0x8e   :  { %2507 = vmatmul.msk.f32.gmra.mxu1 %vm692_vm3, %v209_v54  ;;  %v3227_v54 = vpop.permute.xlu2 %429 }
  0x8f   :  { %940 = vmatmul.f32.gmra.mxu0 %v206_v52 }
  0x92   :  { %664 = vperm.xlu1 %2560, %v366_v55   ;;  %v1510_v55 = vld [vmem:[%s4644_s5 + $0x78] sm:$0xff] }
  0x94   :  { %669 = vperm.xlu0 %2559, %v367_v56   ;;  %v1509_v56 = vld [vmem:[%s4644_s5 + $0x70] sm:$0xff] }
  0x95   :  { %659 = vperm.xlu2 %2561, %v365_v58   ;;  %v224_v58 = vld [vmem:[%s4643_s2 + $0x160] sm:$0xff] }
  0x96   :  { %2508 = vmatmul.msk.f32.gmra.mxu1 %vm692_vm3, %v211_v59  ;;  %v1511_v59 = vld [vmem:[%s4644_s5 + $0x80] sm:$0xff] }
  0x97   :  { %943 = vmatmul.f32.gmra.mxu0 %v208_v57 }
  0x9a   :  { %649 = vperm.xlu1 %2560, %v363_v60  }
  0x9b   :  { %v1111_v0 = vpop.f32.mrf.mxu1 }
  0x9c   :  { %654 = vperm.xlu0 %2559, %v364_v61   ;;  %v227_v61 = vld [vmem:[%s4643_s2 + $0x178] sm:$0xff] }
  0x9d   :  { %644 = vperm.xlu2 %2561, %v362_v63   ;;  %v3253_v63 = vpop.permute.xlu2 %509 }
  0x9e   :  { %2509 = vmatmul.msk.f32.gmra.mxu1 %vm692_vm3, %v213_v1 }
  0x9f   :  { %946 = vmatmul.f32.gmra.mxu0 %v210_v62  ;;  %v1513_v62 = vld [vmem:[%s4644_s5 + $0x90] sm:$0xff] }
  0xa2   :  { %634 = vperm.xlu1 %2560, %v360_v2   ;;  %v226_v2 = vld [vmem:[%s4643_s2 + $0x170] sm:$0xff] }
  0xa3   :  { %v3114_v9 = vpop.f32.mrf.mxu1 }
  0xa4   :  { %v902_v5 = vpop.f32.mrf.mxu0  ;;  %639 = vperm.xlu0 %2559, %v361_v3   ;;  %v1514_v3 = vld [vmem:[%s4644_s5 + $0x98] sm:$0xff] }
  0xa5   :  { %v903_v8 = vadd.f32 %v902_v5, %v375_v4  ;;  %629 = vperm.xlu2 %2561, %v359_v7   ;;  %v229_v5 = vld [vmem:[%s4643_s2 + $0x188] sm:$0xff]  ;;  %v1515_v7 = vld [vmem:[%s4644_s5 + $0xa0] sm:$0xff] }
  0xa6   :  { %2510 = vmatmul.msk.f32.gmra.mxu1 %vm692_vm3, %v215_v10 }
  0xa7   :  { %v3119_v11 = vadd.f32 %v1111_v0, %v903_v8  ;;  %949 = vmatmul.f32.gmra.mxu0 %v212_v6  ;;  %v1512_v0 = vld [vmem:[%s4644_s5 + $0x88] sm:$0xff]  ;;  %v415_v8 = vpop.permute.xlu2 %414 }
  0xa8   :  { %v1516_v6 = vld [vmem:[%s4644_s5 + $0xa8] sm:$0xff] }
  0xaa   :  { %1529 = vperm.xlu1 %2560, %v1495_v13   ;;  %v228_v13 = vld [vmem:[%s4643_s2 + $0x180] sm:$0xff] }
  0xab   :  { %v1117_v18 = vpop.f32.mrf.mxu1 }
  0xac   :  { %v3130_v15 = vpop.f32.mrf.mxu0  ;;  %624 = vperm.xlu0 %2559, %v358_v14   ;;  %v1517_v14 = vld [vmem:[%s4644_s5 + $0xb0] sm:$0xff] }
  0xad   :  { %1534 = vperm.xlu2 %2561, %v1496_v17  }
  0xae   :  { %2511 = vmatmul.msk.f32.gmra.mxu1 %vm692_vm3, %v217_v19 }
  0xaf   :  { %952 = vmatmul.f32.gmra.mxu0 %v214_v16 }
  0xb2   :  { %1544 = vperm.xlu1 %2560, %v1498_v20   ;;  %v1519_v20 = vld [vmem:[%s4644_s5 + $0xc0] sm:$0xff] }
  0xb3   :  { %v3156_v28 = vpop.f32.mrf.mxu1 }
  0xb4   :  { %v908_v24 = vpop.f32.mrf.mxu0  ;;  %1539 = vperm.xlu0 %2559, %v1497_v22   ;;  %v1518_v22 = vld [vmem:[%s4644_s5 + $0xb8] sm:$0xff] }
  0xb5   :  { %v909_v27 = vadd.f32 %v908_v24, %v385_v23  ;;  %1549 = vperm.xlu2 %2561, %v1499_v26   ;;  %v3296_v23 = vpop.permute.xlu1 %389  ;;  %v1520_v26 = vld [vmem:[%s4644_s5 + $0xc8] sm:$0xff] }
  0xb6   :  { %2512 = vmatmul.msk.f32.gmra.mxu1 %vm692_vm3, %v219_v29  ;;  %v233_v29 = vld [vmem:[%s4643_s2 + $0x1a8] sm:$0xff] }
  0xb7   :  { %v3161_v30 = vadd.f32 %v1117_v18, %v909_v27  ;;  %955 = vmatmul.f32.gmra.mxu0 %v216_v25  ;;  %v231_v18 = vld [vmem:[%s4643_s2 + $0x198] sm:$0xff]  ;;  %v230_v25 = vld [vmem:[%s4643_s2 + $0x190] sm:$0xff] }
  0xba   :  { %1559 = vperm.xlu1 %2560, %v1501_v31   ;;  %v1522_v31 = vld [vmem:[%s4644_s5 + $0xd8] sm:$0xff] }
  0xbb   :  { %v3180_v37 = vpop.f32.mrf.mxu1 }
  0xbc   :  { %v3170_v33 = vpop.f32.mrf.mxu0  ;;  %1554 = vperm.xlu0 %2559, %v1500_v32   ;;  %v3315_v32 = vpop.permute.xlu0 %379 }
  0xbd   :  { %1564 = vperm.xlu2 %2561, %v1502_v36  }
  0xbe   :  { %2513 = vmatmul.msk.f32.gmra.mxu1 %vm692_vm3, %v221_v38  ;;  %v232_v38 = vld [vmem:[%s4643_s2 + $0x1a0] sm:$0xff] }
  0xbf   :  { %958 = vmatmul.f32.gmra.mxu0 %v218_v34  ;;  %v1521_v34 = vld [vmem:[%s4644_s5 + $0xd0] sm:$0xff] }
  0xc2   :  { %1574 = vperm.xlu1 %2560, %v1504_v39   ;;  %v1523_v39 = vld [vmem:[%s4644_s5 + $0xe0] sm:$0xff] }
  0xc3   :  { %v3202_v45 = vpop.f32.mrf.mxu1 }
  0xc4   :  { %v3192_v41 = vpop.f32.mrf.mxu0  ;;  %1569 = vperm.xlu0 %2559, %v1503_v40   ;;  %v3328_v40 = vpop.permute.xlu1 %449 }
  0xc5   :  { %1579 = vperm.xlu2 %2561, %v1505_v43   ;;  %v235_v43 = vld [vmem:[%s4643_s2 + $0x1b8] sm:$0xff] }
  0xc6   :  { %2514 = vmatmul.msk.f32.gmra.mxu1 %vm692_vm3, %v223_v46  ;;  %v1525_v46 = vld [vmem:[%s4644_s5 + $0xf0] sm:$0xff] }
  0xc7   :  { %961 = vmatmul.f32.gmra.mxu0 %v220_v42 }
  0xca   :  { %1589 = vperm.xlu1 %2560, %v1507_v47   ;;  %v1524_v47 = vld [vmem:[%s4644_s5 + $0xe8] sm:$0xff] }
  0xcb   :  { %v3222_v52 = vpop.f32.mrf.mxu1 }
  0xcc   :  { %v3214_v49 = vpop.f32.mrf.mxu0  ;;  %1584 = vperm.xlu0 %2559, %v1506_v48   ;;  %v3342_v48 = vpop.permute.xlu0 %404 }
  0xcd   :  { %1594 = vperm.xlu2 %2561, %v1508_v51   ;;  %v234_v51 = vld [vmem:[%s4643_s2 + $0x1b0] sm:$0xff] }
  0xce   :  { %2515 = vmatmul.msk.f32.gmra.mxu1 %vm692_vm3, %v225_v53  ;;  %v1526_v53 = vld [vmem:[%s4644_s5 + $0xf8] sm:$0xff] }
  0xcf   :  { %964 = vmatmul.f32.gmra.mxu0 %v222_v50 }
  0xd2   :  { %1604 = vperm.xlu1 %2560, %v1510_v55  }
  0xd3   :  { %v3244_v60 = vpop.f32.mrf.mxu1 }
  0xd4   :  { %v3236_v57 = vpop.f32.mrf.mxu0  ;;  %1599 = vperm.xlu0 %2559, %v1509_v56   ;;  %v237_v56 = vld [vmem:[%s4643_s2 + $0x1c8] sm:$0xff] }
  0xd5   :  { %1609 = vperm.xlu2 %2561, %v1511_v59   ;;  %v2172_v59 = vld [vmem:[%s4645_s6 + $0x8] sm:$0xff] }
  0xd6   :  { %2516 = vmatmul.msk.f32.gmra.mxu1 %vm692_vm3, %v227_v61  ;;  %v2171_v61 = vld [vmem:[%s4645_s6] sm:$0xff] }
  0xd7   :  { %967 = vmatmul.f32.gmra.mxu0 %v224_v58  ;;  %v440_v58 = vpop.permute.xlu1 %439 }
  0xda   :  { %1619 = vperm.xlu1 %2560, %v1513_v62  }
  0xdb   :  { %v1135_v4 = vpop.f32.mrf.mxu1 }
  0xdc   :  { %v3258_v1 = vpop.f32.mrf.mxu0  ;;  %1614 = vperm.xlu0 %2559, %v1512_v0   ;;  %v236_v0 = vld [vmem:[%s4643_s2 + $0x1c0] sm:$0xff] }
  0xdd   :  { %1624 = vperm.xlu2 %2561, %v1514_v3   ;;  %v3370_v3 = vpop.permute.xlu0 %529 }
  0xde   :  { %2517 = vmatmul.msk.f32.gmra.mxu1 %vm692_vm3, %v229_v5  ;;  %v239_v5 = vld [vmem:[%s4643_s2 + $0x1d8] sm:$0xff] }
  0xdf   :  { %970 = vmatmul.f32.gmra.mxu0 %v226_v2  ;;  %v2173_v2 = vld [vmem:[%s4645_s6 + $0x10] sm:$0xff] }
  0xe2   :  { %1634 = vperm.xlu1 %2560, %v1516_v6   ;;  %v2175_v6 = vld [vmem:[%s4645_s6 + $0x20] sm:$0xff] }
  0xe3   :  { %v3282_v17 = vpop.f32.mrf.mxu1 }
  0xe4   :  { %v926_v10 = vpop.f32.mrf.mxu0  ;;  %1629 = vperm.xlu0 %2559, %v1515_v7   ;;  %v3379_v7 = vpop.permute.xlu1 %519 }
  0xe5   :  { %v927_v16 = vadd.f32 %v926_v10, %v415_v8  ;;  %1639 = vperm.xlu2 %2561, %v1517_v14   ;;  %v2174_v8 = vld [vmem:[%s4645_s6 + $0x18] sm:$0xff]  ;;  %v2176_v14 = vld [vmem:[%s4645_s6 + $0x28] sm:$0xff] }
  0xe6   :  { %2518 = vmatmul.msk.f32.gmra.mxu1 %vm692_vm3, %v231_v18  ;;  %v241_v18 = vld [vmem:[%s4643_s2 + $0x1e8] sm:$0xff] }
  0xe7   :  { %v3287_v19 = vadd.f32 %v1135_v4, %v927_v16  ;;  %973 = vmatmul.f32.gmra.mxu0 %v228_v13  ;;  %v238_v13 = vld [vmem:[%s4643_s2 + $0x1d0] sm:$0xff] }
  0xea   :  { %1649 = vperm.xlu1 %2560, %v1519_v20   ;;  %v435_v20 = vpop.permute.xlu0 %434 }
  0xeb   :  { %v3306_v27 = vpop.f32.mrf.mxu1 }
  0xec   :  { %v3298_v24 = vpop.f32.mrf.mxu0  ;;  %1644 = vperm.xlu0 %2559, %v1518_v22   ;;  %v2178_v22 = vld [vmem:[%s4645_s6 + $0x38] sm:$0xff] }
  0xed   :  { %1654 = vperm.xlu2 %2561, %v1520_v26   ;;  %v425_v26 = vpop.permute.xlu1 %424 }
  0xee   :  { %2519 = vmatmul.msk.f32.gmra.mxu1 %vm692_vm3, %v233_v29 }
  0xef   :  { %976 = vmatmul.f32.gmra.mxu0 %v230_v25  ;;  %v2177_v25 = vld [vmem:[%s4645_s6 + $0x30] sm:$0xff] }
  0xf2   :  { %1664 = vperm.xlu1 %2560, %v1522_v31   ;;  %v240_v31 = vld [vmem:[%s4643_s2 + $0x1e0] sm:$0xff] }
  0xf3   :  { %v3330_v42 = vpop.f32.mrf.mxu1 }
  0xf4   :  { %v3320_v36 = vpop.f32.mrf.mxu0  ;;  %1659 = vperm.xlu0 %2559, %v1521_v34   ;;  %v2179_v34 = vld [vmem:[%s4645_s6 + $0x40] sm:$0xff] }
  0xf5   :  { %1669 = vperm.xlu2 %2561, %v1523_v39   ;;  %v243_v39 = vld [vmem:[%s4643_s2 + $0x1f8] sm:$0xff] }
  0xf6   :  { %2520 = vmatmul.msk.f32.gmra.mxu1 %vm692_vm3, %v235_v43  ;;  %v2181_v43 = vld [vmem:[%s4645_s6 + $0x50] sm:$0xff] }
  0xf7   :  { %979 = vmatmul.f32.gmra.mxu0 %v232_v38 }
  0xfa   :  { %1679 = vperm.xlu1 %2560, %v1525_v46   ;;  %v3413_v46 = vpop.permute.xlu0 %514 }
  0xfb   :  { %v3352_v55 = vpop.f32.mrf.mxu1 }
  0xfc   :  { %v3344_v50 = vpop.f32.mrf.mxu0  ;;  %1674 = vperm.xlu0 %2559, %v1524_v47   ;;  %v2180_v47 = vld [vmem:[%s4645_s6 + $0x48] sm:$0xff] }
  0xfd   :  { %1684 = vperm.xlu2 %2561, %v1526_v53  }
  0xfe   :  { %2521 = vmatmul.msk.f32.gmra.mxu1 %vm692_vm3, %v237_v56  ;;  %v242_v56 = vld [vmem:[%s4643_s2 + $0x1f0] sm:$0xff] }
  0xff   :  { %982 = vmatmul.f32.gmra.mxu0 %v234_v51 }
 0x102   :  { %2210 = vperm.xlu1 %2560, %v2172_v59   ;;  %v2182_v59 = vld [vmem:[%s4645_s6 + $0x58] sm:$0xff] }
 0x103   :  { %v1150_v4 = vpop.f32.mrf.mxu1 }
 0x104   :  { %v938_v62 = vpop.f32.mrf.mxu0  ;;  %2205 = vperm.xlu0 %2559, %v2171_v61  }
 0x105   :  { %2215 = vperm.xlu2 %2561, %v2173_v2   ;;  %v3426_v2 = vpop.permute.xlu1 %504 }
 0x106   :  { %2522 = vmatmul.msk.f32.gmra.mxu1 %vm692_vm3, %v239_v5 }
 0x107   :  { %985 = vmatmul.f32.gmra.mxu0 %v236_v0 }
 0x10a   :  { %2225 = vperm.xlu1 %2560, %v2175_v6   ;;  %v939_v6 = vadd.f32 %v938_v62, %v435_v20  ;;  %v933_v62 = vadd.f32 %v3320_v36, %v425_v26  ;;  %v2185_v36 = vld [vmem:[%s4645_s6 + $0x70] sm:$0xff]  ;;  %v247_v26 = vld [vmem:[%s4643_s2 + $0x218] sm:$0xff] }
 0x10b   :  { %v1153_v16 = vpop.f32.mrf.mxu1 }
 0x10c   :  { %v941_v10 = vpop.f32.mrf.mxu0  ;;  %2220 = vperm.xlu0 %2559, %v2174_v8  }
 0x10d   :  { %2230 = vperm.xlu2 %2561, %v2176_v14   ;;  %v942_v61 = vadd.f32 %v941_v10, %v440_v58  ;;  %v2184_v58 = vld [vmem:[%s4645_s6 + $0x68] sm:$0xff] }
 0x10e   :  { %2523 = vmatmul.msk.f32.gmra.mxu1 %vm692_vm3, %v241_v18  ;;  %v2183_v18 = vld [vmem:[%s4645_s6 + $0x60] sm:$0xff] }
 0x10f   :  { %988 = vmatmul.f32.gmra.mxu0 %v238_v13  ;;  %v1151_v10 = vadd.f32 %v1150_v4, %v942_v61  ;;  %v249_v61 = vld [vmem:[%s4643_s2 + $0x228] sm:$0xff] }
 0x112   :  { %2240 = vperm.xlu1 %2560, %v2178_v22   ;;  %v420_v22 = vpop.permute.xlu0 %419 }
 0x113   :  { %v1156_v38 = vpop.f32.mrf.mxu1 }
 0x114   :  { %v944_v29 = vpop.f32.mrf.mxu0  ;;  %2235 = vperm.xlu0 %2559, %v2177_v25  }
 0x115   :  { %2245 = vperm.xlu2 %2561, %v2179_v34   ;;  %v945_v51 = vadd.f32 %v944_v29, %v3175_v35  ;;  %v245_v35 = vld [vmem:[%s4643_s2 + $0x208] sm:$0xff]  ;;  %v1316_v29 = vmax.f32 %v1151_v10, 0.0  ;;  %v410_v34 = vpop.permute.xlu1 %409  ;;  %v251_v10 = vld [vmem:[%s4643_s2 + $0x238] sm:$0xff] }
 0x116   :  { %2524 = vmatmul.msk.f32.gmra.mxu1 %vm692_vm3, %v243_v39 }
 0x117   :  { %991 = vmatmul.f32.gmra.mxu0 %v240_v31  ;;  %v1154_v8 = vadd.f32 %v1153_v16, %v945_v51  ;;  %v1148_v16 = vadd.f32 %v3352_v55, %v939_v6  ;;  %v1142_v31 = vadd.f32 %v3306_v27, %v933_v62  ;;  %v2186_v27 = vld [vmem:[%s4645_s6 + $0x78] sm:$0xff]  ;;  %v912_v6 = vadd.f32 %v3170_v33, %v3296_v23  ;;  %v248_v33 = vld [vmem:[%s4643_s2 + $0x220] sm:$0xff] }
 0x118   :  { %v1305_v62 = vmax.f32 %v3161_v30, 0.0  ;;  %v253_v30 = vld [vmem:[%s4643_s2 + $0x248] sm:$0xff] }
 0x119   :  { %v1317_v20 = vmax.f32 %v1154_v8, 0.0  ;;  %v1313_v51 = vmax.f32 %v1142_v31, 0.0  ;;  %v1121_v23 = vadd.f32 %v3156_v28, %v912_v6  ;;  %v2197_v31 = vld [vmem:[%s4645_s6 + $0xd0] sm:$0xff] }
 0x11a   :  { %2255 = vperm.xlu1 %2560, %v2181_v43   ;;  %v258_v6 = vld [vmem:[%s4643_s2 + $0x270] sm:$0xff] }
 0x11b   :  { %v3428_v5 = vpop.f32.mrf.mxu1 }
 0x11c   :  { %v947_v53 = vpop.f32.mrf.mxu0  ;;  %2250 = vperm.xlu0 %2559, %v2180_v47   ;;  %v921_v47 = vadd.f32 %v3236_v57, %v3342_v48  ;;  %v2188_v57 = vld [vmem:[%s4645_s6 + $0x88] sm:$0xff] }
 0x11d   :  { %v948_v0 = vadd.f32 %v947_v53, %v3328_v40  ;;  %2260 = vperm.xlu2 %2561, %v2182_v59   ;;  %v936_v40 = vadd.f32 %v3344_v50, %v3227_v54  ;;  %v244_v54 = vld [vmem:[%s4643_s2 + $0x200] sm:$0xff]  ;;  %v930_v50 = vadd.f32 %v3298_v24, %v420_v22  ;;  %v1315_v24 = vmax.f32 %v1148_v16, 0.0  ;;  %v2194_v22 = vld [vmem:[%s4645_s6 + $0xb8] sm:$0xff] }
 0x11e   :  { %2525 = vmatmul.msk.f32.gmra.mxu1 %vm692_vm3, %v245_v35  ;;  %v2190_v35 = vld [vmem:[%s4645_s6 + $0x98] sm:$0xff] }
 0x11f   :  { %994 = vmatmul.f32.gmra.mxu0 %v242_v56  ;;  %v1157_v13 = vadd.f32 %v1156_v38, %v948_v0  ;;  %v1145_v4 = vadd.f32 %v3330_v42, %v936_v40  ;;  %v2187_v42 = vld [vmem:[%s4645_s6 + $0x80] sm:$0xff]  ;;  %v924_v38 = vadd.f32 %v3258_v1, %v410_v34  ;;  %v1139_v39 = vadd.f32 %v3282_v17, %v930_v50  ;;  %v246_v1 = vld [vmem:[%s4643_s2 + $0x210] sm:$0xff]  ;;  %v255_v34 = vld [vmem:[%s4643_s2 + $0x258] sm:$0xff] }
 0x120   :  { %v918_v17 = vadd.f32 %v3214_v49, %v3145_v21  ;;  %v915_v0 = vadd.f32 %v3192_v41, %v3121_v12  ;;  %v1130_v21 = vadd.f32 %v3222_v52, %v921_v47  ;;  %v1311_v49 = vmax.f32 %v3287_v19, 0.0  ;;  %v2189_v52 = vld [vmem:[%s4645_s6 + $0x90] sm:$0xff]  ;;  %v2200_v47 = vld [vmem:[%s4645_s6 + $0xe8] sm:$0xff] }
 0x121   :  { %v1318_v14 = vmax.f32 %v1157_v13, 0.0  ;;  %v1314_v43 = vmax.f32 %v1145_v4, 0.0  ;;  %v1133_v56 = vadd.f32 %v3244_v60, %v924_v38  ;;  %v1312_v59 = vmax.f32 %v1139_v39, 0.0  ;;  %v1367_v4 = vld [vmem:[%s4647_s4] sm:$0xff]  ;;  %v2198_v39 = vld [vmem:[%s4645_s6 + $0xd8] sm:$0xff] }
 0x122   :  { %2270 = vperm.xlu1 %2560, %v2184_v58   ;;  %v13_v60 = vstv %s4646_s7  ;;  %v1127_v12 = vadd.f32 %v3202_v45, %v918_v17  ;;  %v1124_v19 = vadd.f32 %v3180_v37, %v915_v0  ;;  %v1309_v8 = vmax.f32 %v1130_v21, 0.0  ;;  %v2191_v37 = vld [vmem:[%s4645_s6 + $0xa0] sm:$0xff] }
 0x123   :  { %1687 = vmatpush.msra.mxu2 %v1318_v14  ;;  %v3454_v55 = vpop.f32.mrf.mxu1  ;;  %14 = vst [vmem:[#allocation2] sm:$0x1] %v13_v60  ;;  %v1310_v41 = vmax.f32 %v1133_v56, 0.0  ;;  %v906_v45 = vadd.f32 %v3130_v15, %v3315_v32  ;;  %v2193_v15 = vld [vmem:[%s4645_s6 + $0xb0] sm:$0xff]  ;;  %v1306_v32 = vmax.f32 %v1121_v23, 0.0  ;;  %v1303_v50 = vmax.f32 %v3119_v11, 0.0 }
 0x124   :  { %v3444_v25 = vpop.f32.mrf.mxu0  ;;  %2265 = vperm.xlu0 %2559, %v2183_v18   ;;  %v1308_v58 = vmax.f32 %v1127_v12, 0.0  ;;  %v1307_v14 = vmax.f32 %v1124_v19, 0.0  ;;  %v2192_v18 = vld [vmem:[%s4645_s6 + $0xa8] sm:$0xff]  ;;  %v252_v11 = vld [vmem:[%s4643_s2 + $0x240] sm:$0xff]  ;;  %v2202_v56 = vld [vmem:[%s4645_s6 + $0xf8] sm:$0xff]  ;;  %v495_v19 = vpop.permute.xlu2 %494 }
 0x125   :  { %1688 = vmatpush.msra.mxu2 %v1317_v20  ;;  %2275 = vperm.xlu2 %2561, %v2185_v36   ;;  %v1115_v28 = vadd.f32 %v3114_v9, %v906_v45  ;;  %v250_v20 = vld [vmem:[%s4643_s2 + $0x230] sm:$0xff]  ;;  %v2195_v36 = vld [vmem:[%s4645_s6 + $0xc0] sm:$0xff] }
 0x126   :  { %2526 = vmatmul.msk.f32.gmra.mxu1 %vm692_vm3, %v247_v26  ;;  %v2199_v38 = vld [vmem:[%s4645_s6 + $0xe0] sm:$0xff] }
 0x127   :  { %997 = vmatmul.f32.gmra.mxu0 %v244_v54  ;;  %1689 = vmatpush.msra.mxu2 %v1316_v29  ;;  %v1304_v9 = vmax.f32 %v1115_v28, 0.0  ;;  %v2196_v29 = vld [vmem:[%s4645_s6 + $0xc8] sm:$0xff]  ;;  %v1375_v17 = vld [vmem:[%s4647_s4 + $0x40] sm:$0xff] }
 0x128   :  { %v1379_v60 = vld [vmem:[%s4647_s4 + $0x60] sm:$0xff] }
 0x129   :  { %1690 = vmatpush.msra.mxu2 %v1315_v24 }
 0x12a   :  { %2285 = vperm.xlu1 %2560, %v2187_v42   ;;  %v1371_v42 = vld [vmem:[%s4647_s4 + $0x20] sm:$0xff] }
 0x12b   :  { %1691 = vmatpush.msra.mxu2 %v1314_v43  ;;  %v3482_v48 = vpop.f32.mrf.mxu1  ;;  %v2432_v0 = vld [vmem:[#allocation2] sm:$0x1] }
 0x12c   :  { %v3471_v53 = vpop.f32.mrf.mxu0  ;;  %2280 = vperm.xlu0 %2559, %v2186_v27   ;;  %v254_v27 = vld [vmem:[%s4643_s2 + $0x250] sm:$0xff] }
 0x12d   :  { %1692 = vmatpush.msra.mxu2 %v1313_v51  ;;  %2290 = vperm.xlu2 %2561, %v2188_v57  }
 0x12e   :  { %2527 = vmatmul.msk.f32.gmra.mxu1 %vm692_vm3, %v249_v61  ;;  %v256_v61 = vld [vmem:[%s4643_s2 + $0x260] sm:$0xff] }
 0x12f   :  { %1000 = vmatmul.f32.gmra.mxu0 %v246_v1  ;;  %1693 = vmatpush.msra.mxu2 %v1312_v59  ;;  %v257_v1 = vld [vmem:[%s4643_s2 + $0x268] sm:$0xff]  ;;  %v2201_v59 = vld [vmem:[%s4645_s6 + $0xf0] sm:$0xff] }
 0x131   :  { %1694 = vmatpush.msra.mxu2 %v1311_v49  ;;  %v259_v49 = vld [vmem:[%s4643_s2 + $0x278] sm:$0xff] }
 0x132   :  { %2300 = vperm.xlu1 %2560, %v2190_v35  }
 0x133   :  { %1695 = vmatpush.msra.mxu2 %v1310_v41  ;;  %v3516_v40 = vpop.f32.mrf.mxu1  ;;  %v261_v41 = vld [vmem:[%s4643_s2 + $0x288] sm:$0xff] }
 0x134   :  { %v3505_v13 = vpop.f32.mrf.mxu0  ;;  %2295 = vperm.xlu0 %2559, %v2189_v52   ;;  %v1383_v52 = vld [vmem:[%s4647_s4 + $0x80] sm:$0xff] }
 0x135   :  { %1696 = vmatpush.msra.mxu2 %v1309_v8  ;;  %2305 = vperm.xlu2 %2561, %v2191_v37  }
 0x136   :  { %2528 = vmatmul.msk.f32.gmra.mxu1 %vm692_vm3, %v251_v10  ;;  %v1387_v10 = vld [vmem:[%s4647_s4 + $0xa0] sm:$0xff] }
 0x137   :  { %1003 = vmatmul.f32.gmra.mxu0 %v248_v33  ;;  %1697 = vmatpush.msra.mxu2 %v1308_v58  ;;  %v260_v33 = vld [vmem:[%s4643_s2 + $0x280] sm:$0xff]  ;;  %v263_v58 = vld [vmem:[%s4643_s2 + $0x298] sm:$0xff] }
 0x139   :  { %1698 = vmatpush.msra.mxu2 %v1307_v14 }
 0x13a   :  { %2315 = vperm.xlu1 %2560, %v2193_v15   ;;  %v262_v15 = vld [vmem:[%s4643_s2 + $0x290] sm:$0xff] }
 0x13b   :  { %1699 = vmatpush.msra.mxu2 %v1306_v32  ;;  %v3538_v54 = vpop.f32.mrf.mxu1  ;;  %v265_v32 = vld [vmem:[%s4643_s2 + $0x2a8] sm:$0xff] }
 0x13c   :  { %v3530_v16 = vpop.f32.mrf.mxu0  ;;  %2310 = vperm.xlu0 %2559, %v2192_v18   ;;  %v1391_v18 = vld [vmem:[%s4647_s4 + $0xc0] sm:$0xff] }
 0x13d   :  { %1700 = vmatpush.msra.mxu2 %v1305_v62  ;;  %2320 = vperm.xlu2 %2561, %v2194_v22   ;;  %v267_v22 = vld [vmem:[%s4643_s2 + $0x2b8] sm:$0xff] }
 0x13e   :  { %2529 = vmatmul.msk.f32.gmra.mxu1 %vm692_vm3, %v253_v30  ;;  %v1395_v30 = vld [vmem:[%s4647_s4 + $0xe0] sm:$0xff] }
 0x13f   :  { %1006 = vmatmul.f32.gmra.mxu0 %v250_v20  ;;  %1701 = vmatpush.msra.mxu2 %v1304_v9  ;;  %v264_v20 = vld [vmem:[%s4643_s2 + $0x2a0] sm:$0xff] }
 0x141   :  { %1702 = vmatpush.msra.mxu2 %v1303_v50 }
 0x142   :  { %1703 = vmatmul.f32.vlgmr.msra.gmra.mxu2 %v1367_v4  ;;  %2330 = vperm.xlu1 %2560, %v2196_v29   ;;  %v266_v4 = vld [vmem:[%s4643_s2 + $0x2b0] sm:$0xff] }
 0x143   :  { %v3562_v24 = vpop.f32.mrf.mxu1 }
 0x144   :  { %v3554_v26 = vpop.f32.mrf.mxu0  ;;  %2325 = vperm.xlu0 %2559, %v2195_v36   ;;  %v269_v36 = vld [vmem:[%s4643_s2 + $0x2c8] sm:$0xff] }
 0x145   :  { %2335 = vperm.xlu2 %2561, %v2197_v31  }
 0x146   :  { %2530 = vmatmul.msk.f32.gmra.mxu1 %vm692_vm3, %v255_v34  ;;  %v268_v34 = vld [vmem:[%s4643_s2 + $0x2c0] sm:$0xff] }
 0x147   :  { %1009 = vmatmul.f32.gmra.mxu0 %v252_v11  ;;  %v1399_v11 = vld [vmem:[%s4647_s4 + $0x100] sm:$0xff] }
 0x14a   :  { %1706 = vmatmul.f32.gmra.mxu2 %v1371_v42  ;;  %2345 = vperm.xlu1 %2560, %v2199_v38   ;;  %v271_v38 = vld [vmem:[%s4643_s2 + $0x2d8] sm:$0xff] }
 0x14b   :  { %v3585_v51 = vpop.f32.mrf.mxu1 }
 0x14c   :  { %v3577_v43 = vpop.f32.mrf.mxu0  ;;  %2340 = vperm.xlu0 %2559, %v2198_v39   ;;  %v1403_v39 = vld [vmem:[%s4647_s4 + $0x120] sm:$0xff] }
 0x14d   :  { %2350 = vperm.xlu2 %2561, %v2200_v47   ;;  %v270_v47 = vld [vmem:[%s4643_s2 + $0x2d0] sm:$0xff] }
 0x14e   :  { %2531 = vmatmul.msk.f32.gmra.mxu1 %vm692_vm3, %v257_v1 }
 0x14f   :  { %1012 = vmatmul.f32.gmra.mxu0 %v254_v27 }
 0x152   :  { %1709 = vmatmul.f32.gmra.mxu2 %v1375_v17  ;;  %2360 = vperm.xlu1 %2560, %v2202_v56   ;;  %v273_v17 = vld [vmem:[%s4643_s2 + $0x2e8] sm:$0xff]  ;;  %v1407_v56 = vld [vmem:[%s4647_s4 + $0x140] sm:$0xff] }
 0x153   :  { %v3605_v21 = vpop.f32.mrf.mxu1 }
 0x154   :  { %v3600_v57 = vpop.f32.mrf.mxu0  ;;  %2355 = vperm.xlu0 %2559, %v2201_v59   ;;  %v3695_v59 = vpop.permute.xlu2 %479 }
 0x155   :  { %2435 = vperm.xlu2 %2561, %v2432_v0   ;;  %v272_v0 = vld [vmem:[%s4643_s2 + $0x2e0] sm:$0xff] }
 0x156   :  { %2532 = vmatmul.msk.f32.gmra.mxu1 %vm692_vm3, %v259_v49  ;;  %v500_v49 = vpop.permute.xlu0 %499 }
 0x157   :  { %1015 = vmatmul.f32.gmra.mxu0 %v256_v61 }
 0x15a   :  { %1712 = vmatmul.f32.gmra.mxu2 %v1379_v60 }
 0x15b   :  { %v1183_v12 = vpop.f32.mrf.mxu1 }
 0x15c   :  { %v3614_v35 = vpop.f32.mrf.mxu0 }
 0x15e   :  { %2533 = vmatmul.msk.f32.gmra.mxu1 %vm692_vm3, %v261_v41  ;;  %v3708_v41 = vpop.permute.xlu2 %464 }
 0x15f   :  { %1018 = vmatmul.f32.gmra.mxu0 %v258_v6  ;;  %v275_v6 = vld [vmem:[%s4643_s2 + $0x2f8] sm:$0xff] }
 0x162   :  { %1715 = vmatmul.f32.gmra.mxu2 %v1383_v52 }
 0x163   :  { %v3629_v23 = vpop.f32.mrf.mxu1 }
 0x164   :  { %v974_v8 = vpop.f32.mrf.mxu0 }
 0x165   :  { %v975_v45 = vadd.f32 %v974_v8, %v495_v19  ;;  %v274_v8 = vld [vmem:[%s4643_s2 + $0x2f0] sm:$0xff] }
 0x166   :  { %2534 = vmatmul.msk.f32.gmra.mxu1 %vm692_vm3, %v263_v58 }
 0x167   :  { %v3634_v37 = vadd.f32 %v1183_v12, %v975_v45  ;;  %1021 = vmatmul.f32.gmra.mxu0 %v260_v33  ;;  %v1411_v12 = vld [vmem:[%s4647_s4 + $0x160] sm:$0xff] }
 0x16a   :  { %1718 = vmatmul.f32.gmra.mxu2 %v1387_v10  ;;  %v277_v10 = vld [vmem:[%s4643_s2 + $0x308] sm:$0xff] }
 0x16b   :  { %v3645_v28 = vpop.f32.mrf.mxu1 }
 0x16c   :  { %v3640_v14 = vpop.f32.mrf.mxu0 }
 0x16e   :  { %2535 = vmatmul.msk.f32.gmra.mxu1 %vm692_vm3, %v265_v32 }
 0x16f   :  { %1024 = vmatmul.f32.gmra.mxu0 %v262_v15 }
 0x172   :  { %1721 = vmatmul.f32.gmra.mxu2 %v1391_v18 }
 0x173   :  { %v3657_v9 = vpop.f32.mrf.mxu1 }
 0x174   :  { %v980_v62 = vpop.f32.mrf.mxu0 }
 0x176   :  { %2536 = vmatmul.msk.f32.gmra.mxu1 %vm692_vm3, %v267_v22 }
 0x177   :  { %1027 = vmatmul.f32.gmra.mxu0 %v264_v20  ;;  %v490_v20 = vpop.permute.xlu0 %489 }
 0x17a   :  { %1724 = vmatmul.f32.gmra.mxu2 %v1395_v30 }
 0x17b   :  { %v1195_v29 = vpop.f32.mrf.mxu1 }
 0x17c   :  { %v983_v50 = vpop.f32.mrf.mxu0 }
 0x17d   :  { %v984_v22 = vadd.f32 %v983_v50, %v3253_v63 }
 0x17e   :  { %2537 = vmatmul.msk.f32.gmra.mxu1 %vm692_vm3, %v269_v36 }
 0x17f   :  { %1030 = vmatmul.f32.gmra.mxu0 %v266_v4  ;;  %v981_v4 = vadd.f32 %v980_v62, %v3426_v2  ;;  %v1193_v63 = vadd.f32 %v3657_v9, %v984_v22  ;;  %v279_v2 = vld [vmem:[%s4643_s2 + $0x318] sm:$0xff]  ;;  %v972_v9 = vadd.f32 %v3614_v35, %v490_v20  ;;  %v966_v35 = vadd.f32 %v3577_v43, %v3695_v59  ;;  %v1423_v43 = vld [vmem:[%s4647_s4 + $0x1c0] sm:$0xff] }
 0x181   :  { %v1190_v62 = vadd.f32 %v3645_v28, %v981_v4  ;;  %v1175_v59 = vadd.f32 %v3562_v24, %v966_v35  ;;  %v1368_v4 = vld [vmem:[%s4647_s4 + $0x8] sm:$0xff]  ;;  %v1443_v35 = vld [vmem:[%s4647_s4 + $0x260] sm:$0xff] }
 0x182   :  { %1727 = vmatmul.f32.gmra.mxu2 %v1399_v11  ;;  %v535_v11 = vpop.permute.xlu2 %534 }
 0x183   :  { %v1198_v42 = vpop.f32.mrf.mxu1 }
 0x184   :  { %v986_v31 = vpop.f32.mrf.mxu0 }
 0x185   :  { %v987_v15 = vadd.f32 %v986_v31, %v3413_v46 }
 0x186   :  { %2538 = vmatmul.msk.f32.gmra.mxu1 %vm692_vm3, %v271_v38  ;;  %v978_v38 = vadd.f32 %v3640_v14, %v500_v49  ;;  %v1419_v14 = vld [vmem:[%s4647_s4 + $0x1a0] sm:$0xff]  ;;  %v278_v49 = vld [vmem:[%s4643_s2 + $0x310] sm:$0xff] }
 0x187   :  { %1033 = vmatmul.f32.gmra.mxu0 %v268_v34  ;;  %v1196_v36 = vadd.f32 %v1195_v29, %v987_v15  ;;  %v276_v34 = vld [vmem:[%s4643_s2 + $0x300] sm:$0xff] }
 0x18a   :  { %1730 = vmatmul.f32.gmra.mxu2 %v1403_v39 }
 0x18b   :  { %v1201_v1 = vpop.f32.mrf.mxu1 }
 0x18c   :  { %v989_v27 = vpop.f32.mrf.mxu0 }
 0x18d   :  { %v990_v33 = vadd.f32 %v989_v27, %v3379_v7  ;;  %v1331_v27 = vmax.f32 %v1196_v36, 0.0 }
 0x18e   :  { %2539 = vmatmul.msk.f32.gmra.mxu1 %vm692_vm3, %v273_v17  ;;  %v475_v17 = vpop.permute.xlu0 %474 }
 0x18f   :  { %1036 = vmatmul.f32.gmra.mxu0 %v270_v47  ;;  %v1199_v7 = vadd.f32 %v1198_v42, %v990_v33  ;;  %v1187_v47 = vadd.f32 %v3629_v23, %v978_v38  ;;  %v1181_v23 = vadd.f32 %v3605_v21, %v972_v9  ;;  %v1435_v38 = vld [vmem:[%s4647_s4 + $0x220] sm:$0xff] }
 0x190   :  { %v1439_v9 = vld [vmem:[%s4647_s4 + $0x240] sm:$0xff] }
 0x191   :  { %v1332_v42 = vmax.f32 %v1199_v7, 0.0 }
 0x192   :  { %1733 = vmatmul.f32.gmra.mxu2 %v1407_v56  ;;  %v1329_v56 = vmax.f32 %v1190_v62, 0.0 }
 0x193   :  { %v1204_v60 = vpop.f32.mrf.mxu1 }
 0x194   :  { %v992_v61 = vpop.f32.mrf.mxu0 }
 0x195   :  { %v993_v52 = vadd.f32 %v992_v61, %v3200_v44  ;;  %v1415_v44 = vld [vmem:[%s4647_s4 + $0x180] sm:$0xff] }
 0x196   :  { %2540 = vmatmul.msk.f32.gmra.mxu1 %vm692_vm3, %v275_v6  ;;  %v460_v33 = vpop.permute.xlu0 %459 }
 0x197   :  { %1039 = vmatmul.f32.gmra.mxu0 %v272_v0  ;;  %v1202_v32 = vadd.f32 %v1201_v1, %v993_v52  ;;  %v1330_v1 = vmax.f32 %v1193_v63, 0.0  ;;  %v954_v24 = vadd.f32 %v3471_v53, %v460_v33  ;;  %v1427_v53 = vld [vmem:[%s4647_s4 + $0x1e0] sm:$0xff]  ;;  %v1372_v63 = vld [vmem:[%s4647_s4 + $0x28] sm:$0xff] }
 0x199   :  { %v1333_v46 = vmax.f32 %v1202_v32, 0.0 }
 0x19a   :  { %1736 = vmatmul.f32.gmra.mxu2 %v1411_v12  ;;  %v963_v12 = vadd.f32 %v3554_v26, %v475_v17  ;;  %v957_v26 = vadd.f32 %v3505_v13, %v3708_v41  ;;  %v283_v13 = vld [vmem:[%s4643_s2 + $0x338] sm:$0xff] }
 0x19b   :  { %v1207_v58 = vpop.f32.mrf.mxu1 }
 0x19c   :  { %v995_v19 = vpop.f32.mrf.mxu0  ;;  %v1166_v41 = vadd.f32 %v3482_v48, %v957_v26  ;;  %v282_v48 = vld [vmem:[%s4643_s2 + $0x330] sm:$0xff]  ;;  %v3890_v26 = vpop.permute.xlu2 %549 }
 0x19d   :  { %v996_v45 = vadd.f32 %v995_v19, %v3370_v3  ;;  %v485_v3 = vpop.permute.xlu1 %484  ;;  %v1327_v19 = vmax.f32 %v3634_v37, 0.0 }
 0x19e   :  { %2541 = vmatmul.msk.f32.gmra.mxu1 %vm692_vm3, %v277_v10  ;;  %v969_v28 = vadd.f32 %v3600_v57, %v485_v3  ;;  %v281_v57 = vld [vmem:[%s4643_s2 + $0x328] sm:$0xff]  ;;  %v1324_v10 = vmax.f32 %v1175_v59, 0.0  ;;  %v1447_v59 = vld [vmem:[%s4647_s4 + $0x280] sm:$0xff] }
 0x19f   :  { %1042 = vmatmul.f32.gmra.mxu0 %v274_v8  ;;  %v1205_v18 = vadd.f32 %v1204_v60, %v996_v45  ;;  %v1328_v60 = vmax.f32 %v1187_v47, 0.0  ;;  %v1326_v8 = vmax.f32 %v1181_v23, 0.0  ;;  %v1376_v47 = vld [vmem:[%s4647_s4 + $0x48] sm:$0xff] }
 0x1a0   :  { %v1178_v52 = vadd.f32 %v3585_v51, %v969_v28  ;;  %v1172_v51 = vadd.f32 %v3538_v54, %v963_v12  ;;  %v288_v28 = vld [vmem:[%s4643_s2 + $0x360] sm:$0xff]  ;;  %v1380_v23 = vld [vmem:[%s4647_s4 + $0x68] sm:$0xff] }
 0x1a1   :  { %v1334_v30 = vmax.f32 %v1205_v18, 0.0 }
 0x1a2   :  { %1739 = vmatmul.f32.gmra.mxu2 %v1415_v44  ;;  %v1325_v37 = vmax.f32 %v1178_v52, 0.0  ;;  %v1323_v44 = vmax.f32 %v1172_v51, 0.0  ;;  %v290_v52 = vld [vmem:[%s4643_s2 + $0x370] sm:$0xff] }
 0x1a3   :  { %1800 = vmatpush.msra.mxu3 %v1334_v30  ;;  %v3731_v39 = vpop.f32.mrf.mxu1 }
 0x1a4   :  { %v998_v31 = vpop.f32.mrf.mxu0 }
 0x1a5   :  { %v999_v50 = vadd.f32 %v998_v31, %v535_v11  ;;  %1801 = vmatpush.msra.mxu3 %v1333_v46  ;;  %v470_v61 = vpop.permute.xlu1 %469  ;;  %v284_v46 = vld [vmem:[%s4643_s2 + $0x340] sm:$0xff] }
 0x1a6   :  { %2542 = vmatmul.msk.f32.gmra.mxu1 %vm692_vm3, %v279_v2  ;;  %v960_v21 = vadd.f32 %v3530_v16, %v470_v61  ;;  %v280_v16 = vld [vmem:[%s4643_s2 + $0x320] sm:$0xff] }
 0x1a7   :  { %v3737_v29 = vadd.f32 %v1207_v58, %v999_v50  ;;  %1045 = vmatmul.f32.gmra.mxu0 %v276_v34  ;;  %1802 = vmatpush.msra.mxu3 %v1332_v42  ;;  %v287_v34 = vld [vmem:[%s4643_s2 + $0x358] sm:$0xff]  ;;  %v286_v42 = vld [vmem:[%s4643_s2 + $0x350] sm:$0xff] }
 0x1a8   :  { %v1169_v58 = vadd.f32 %v3516_v40, %v960_v21  ;;  %v1163_v40 = vadd.f32 %v3454_v55, %v954_v24  ;;  %v285_v55 = vld [vmem:[%s4643_s2 + $0x348] sm:$0xff] }
 0x1a9   :  { %1803 = vmatpush.msra.mxu3 %v1331_v27  ;;  %v289_v27 = vld [vmem:[%s4643_s2 + $0x368] sm:$0xff] }
 0x1aa   :  { %1742 = vmatmul.f32.gmra.mxu2 %v1419_v14  ;;  %v1322_v18 = vmax.f32 %v1169_v58, 0.0  ;;  %v1320_v7 = vmax.f32 %v1163_v40, 0.0  ;;  %v293_v21 = vld [vmem:[%s4643_s2 + $0x388] sm:$0xff]  ;;  %v294_v40 = vld [vmem:[%s4643_s2 + $0x390] sm:$0xff] }
 0x1ab   :  { %1804 = vmatpush.msra.mxu3 %v1330_v1  ;;  %v3754_v6 = vpop.f32.mrf.mxu1  ;;  %v3847_v1 = vpop.permute.xlu0 %539 }
 0x1ac   :  { %v3746_v0 = vpop.f32.mrf.mxu0 }
 0x1ad   :  { %1805 = vmatpush.msra.mxu3 %v1329_v56  ;;  %v455_v15 = vpop.permute.xlu1 %454 }
 0x1ae   :  { %2543 = vmatmul.msk.f32.gmra.mxu1 %vm692_vm3, %v281_v57  ;;  %v951_v54 = vadd.f32 %v3444_v25, %v455_v15  ;;  %v1321_v25 = vmax.f32 %v1166_v41, 0.0  ;;  %v295_v15 = vld [vmem:[%s4643_s2 + $0x398] sm:$0xff]  ;;  %v1388_v41 = vld [vmem:[%s4647_s4 + $0xa8] sm:$0xff] }
 0x1af   :  { %1048 = vmatmul.f32.gmra.mxu0 %v278_v49  ;;  %1806 = vmatpush.msra.mxu3 %v1328_v60  ;;  %v291_v49 = vld [vmem:[%s4643_s2 + $0x378] sm:$0xff] }
 0x1b0   :  { %v1160_v20 = vadd.f32 %v3428_v5, %v951_v54  ;;  %v1431_v5 = vld [vmem:[%s4647_s4 + $0x200] sm:$0xff] }
 0x1b1   :  { %1807 = vmatpush.msra.mxu3 %v1327_v19  ;;  %v1451_v54 = vld [vmem:[%s4647_s4 + $0x2a0] sm:$0xff] }
 0x1b2   :  { %1745 = vmatmul.f32.gmra.mxu2 %v1423_v43  ;;  %v1319_v3 = vmax.f32 %v1160_v20, 0.0 }
 0x1b3   :  { %1808 = vmatpush.msra.mxu3 %v1326_v8  ;;  %v3778_v32 = vpop.f32.mrf.mxu1  ;;  %v3871_v57 = vpop.permute.xlu0 %554  ;;  %v1384_v8 = vld [vmem:[%s4647_s4 + $0x88] sm:$0xff] }
 0x1b4   :  { %v3771_v45 = vpop.f32.mrf.mxu0 }
 0x1b5   :  { %1809 = vmatpush.msra.mxu3 %v1325_v37  ;;  %v3839_v14 = vpop.permute.xlu1 %544 }
 0x1b6   :  { %2544 = vmatmul.msk.f32.gmra.mxu1 %vm692_vm3, %v283_v13 }
 0x1b7   :  { %1051 = vmatmul.f32.gmra.mxu0 %v280_v16  ;;  %1810 = vmatpush.msra.mxu3 %v1324_v10  ;;  %v292_v16 = vld [vmem:[%s4643_s2 + $0x380] sm:$0xff] }
 0x1b9   :  { %1811 = vmatpush.msra.mxu3 %v1323_v44  ;;  %v3913_v44 = vpop.permute.xlu2 %564 }
 0x1ba   :  { %1748 = vmatmul.f32.gmra.mxu2 %v1427_v53 }
 0x1bb   :  { %1812 = vmatpush.msra.mxu3 %v1322_v18  ;;  %v3796_v30 = vpop.f32.mrf.mxu1  ;;  %v3892_v37 = vpop.permute.xlu0 %569 }
 0x1bc   :  { %v3791_v22 = vpop.f32.mrf.mxu0 }
 0x1bd   :  { %1813 = vmatpush.msra.mxu3 %v1321_v25  ;;  %v3868_v60 = vpop.permute.xlu1 %559 }
 0x1be   :  { %2545 = vmatmul.msk.f32.gmra.mxu1 %vm692_vm3, %v285_v55  ;;  %v1392_v55 = vld [vmem:[%s4647_s4 + $0xc8] sm:$0xff] }
 0x1bf   :  { %1054 = vmatmul.f32.gmra.mxu0 %v282_v48  ;;  %1814 = vmatpush.msra.mxu3 %v1320_v7  ;;  %v297_v48 = vld [vmem:[%s4643_s2 + $0x3a8] sm:$0xff]  ;;  %v1455_v7 = vld [vmem:[%s4647_s4 + $0x2c0] sm:$0xff] }
 0x1c1   :  { %1815 = vmatpush.msra.mxu3 %v1319_v3 }
 0x1c2   :  { %1751 = vmatmul.f32.gmra.mxu2 %v1431_v5  ;;  %1816 = vmatmul.f32.vlgmr.msra.gmra.mxu3 %v1368_v4  ;;  %v296_v5 = vld [vmem:[%s4643_s2 + $0x3a0] sm:$0xff] }
 0x1c3   :  { %v3815_v31 = vpop.f32.mrf.mxu1  ;;  %v3922_v20 = vpop.permute.xlu0 %584 }
 0x1c4   :  { %v3808_v36 = vpop.f32.mrf.mxu0 }
 0x1c5   :  { %v3813_v11 = vpop.f32.mrf.mxu2  ;;  %v575_v51 = vpop.permute.xlu1 %574 }
 0x1c6   :  { %2546 = vmatmul.msk.f32.gmra.mxu1 %vm692_vm3, %v287_v34 }
 0x1c7   :  { %1057 = vmatmul.f32.gmra.mxu0 %v284_v46  ;;  %v3943_v46 = vpop.permute.xlu2 %579 }
 0x1ca   :  { %1754 = vmatmul.f32.gmra.mxu2 %v1435_v38  ;;  %1819 = vmatmul.f32.gmra.mxu3 %v1372_v63  ;;  %v299_v38 = vld [vmem:[%s4643_s2 + $0x3b8] sm:$0xff]  ;;  %v1459_v63 = vld [vmem:[%s4647_s4 + $0x2e0] sm:$0xff] }
 0x1cb   :  { %v3834_v62 = vpop.f32.mrf.mxu1 }
 0x1cc   :  { %v3827_v50 = vpop.f32.mrf.mxu0 }
 0x1cd   :  { %v3832_v2 = vpop.f32.mrf.mxu2 }
 0x1ce   :  { %2547 = vmatmul.msk.f32.gmra.mxu1 %vm692_vm3, %v289_v27  ;;  %v600_v27 = vpop.permute.xlu0 %599 }
 0x1cf   :  { %1060 = vmatmul.f32.gmra.mxu0 %v286_v42  ;;  %v1396_v42 = vld [vmem:[%s4647_s4 + $0xe8] sm:$0xff] }
 0x1d2   :  { %1757 = vmatmul.f32.gmra.mxu2 %v1439_v9  ;;  %1822 = vmatmul.f32.gmra.mxu3 %v1376_v47  ;;  %v298_v47 = vld [vmem:[%s4643_s2 + $0x3b0] sm:$0xff] }
 0x1d3   :  { %v3857_v61 = vpop.f32.mrf.mxu1 }
 0x1d4   :  { %v3850_v17 = vpop.f32.mrf.mxu0 }
 0x1d5   :  { %v3855_v56 = vpop.f32.mrf.mxu2 }
 0x1d6   :  { %2548 = vmatmul.msk.f32.gmra.mxu1 %vm692_vm3, %v291_v49 }
 0x1d7   :  { %1063 = vmatmul.f32.gmra.mxu0 %v288_v28  ;;  %v3962_v28 = vpop.permute.xlu1 %589 }
 0x1da   :  { %1760 = vmatmul.f32.gmra.mxu2 %v1443_v35  ;;  %1825 = vmatmul.f32.gmra.mxu3 %v1380_v23  ;;  %v301_v23 = vld [vmem:[%s4643_s2 + $0x3c8] sm:$0xff] }
 0x1db   :  { %v1231_v43 = vpop.f32.mrf.mxu1 }
 0x1dc   :  { %v3873_v12 = vpop.f32.mrf.mxu0 }
 0x1dd   :  { %v3878_v19 = vpop.f32.mrf.mxu2 }
 0x1de   :  { %2549 = vmatmul.msk.f32.gmra.mxu1 %vm692_vm3, %v293_v21  ;;  %v595_v21 = vpop.permute.xlu2 %594 }
 0x1df   :  { %1066 = vmatmul.f32.gmra.mxu0 %v290_v52  ;;  %v1463_v52 = vld [vmem:[%s4647_s4 + $0x300] sm:$0xff] }
 0x1e2   :  { %1763 = vmatmul.f32.gmra.mxu2 %v1447_v59  ;;  %1828 = vmatmul.f32.gmra.mxu3 %v1384_v8  ;;  %v3978_v59 = vpop.permute.xlu0 %614 }
 0x1e3   :  { %v3899_v10 = vpop.f32.mrf.mxu1 }
 0x1e4   :  { %v1022_v33 = vpop.f32.mrf.mxu0 }
 0x1e5   :  { %v1023_v24 = vadd.f32 %v1022_v33, %v575_v51  ;;  %v3897_v58 = vpop.f32.mrf.mxu2  ;;  %v300_v51 = vld [vmem:[%s4643_s2 + $0x3c0] sm:$0xff] }
 0x1e6   :  { %2550 = vmatmul.msk.f32.gmra.mxu1 %vm692_vm3, %v295_v15  ;;  %v605_v15 = vpop.permute.xlu1 %604 }
 0x1e7   :  { %v3904_v13 = vadd.f32 %v1231_v43, %v1023_v24  ;;  %1069 = vmatmul.f32.gmra.mxu0 %v292_v16  ;;  %v1400_v43 = vld [vmem:[%s4647_s4 + $0x108] sm:$0xff]  ;;  %v303_v24 = vld [vmem:[%s4643_s2 + $0x3d8] sm:$0xff] }
 0x1ea   :  { %1766 = vmatmul.f32.gmra.mxu2 %v1451_v54  ;;  %1831 = vmatmul.f32.gmra.mxu3 %v1388_v41  ;;  %v1467_v54 = vld [vmem:[%s4647_s4 + $0x320] sm:$0xff]  ;;  %v1404_v41 = vld [vmem:[%s4647_s4 + $0x128] sm:$0xff] }
 0x1eb   :  { %v3924_v25 = vpop.f32.mrf.mxu1 }
 0x1ec   :  { %v3915_v53 = vpop.f32.mrf.mxu0 }
 0x1ed   :  { %v3920_v18 = vpop.f32.mrf.mxu2 }
 0x1ee   :  { %4663 = vst [vmem:[#allocation3_spill] sm:$0xff] %v3920_v18  ;;  %2551 = vmatmul.msk.f32.gmra.mxu1 %vm692_vm3, %v297_v48  ;;  %v3995_v48 = vpop.permute.xlu0 %684 }
 0x1ef   :  { %1072 = vmatmul.f32.gmra.mxu0 %v294_v40  ;;  %v610_v40 = vpop.permute.xlu2 %609  ;;  %4667 = vst [vmem:[#allocation7_spill] sm:$0xff] %v3995_v48 }
 0x1f2   :  { %1769 = vmatmul.f32.gmra.mxu2 %v1455_v7  ;;  %1834 = vmatmul.f32.gmra.mxu3 %v1392_v55  ;;  %v302_v55 = vld [vmem:[%s4643_s2 + $0x3d0] sm:$0xff] }
 0x1f3   :  { %v3945_v34 = vpop.f32.mrf.mxu1 }
 0x1f4   :  { %v3936_v3 = vpop.f32.mrf.mxu0 }
 0x1f5   :  { %v3941_v4 = vpop.f32.mrf.mxu2 }
 0x1f6   :  { %4664 = vst [vmem:[#allocation4_spill] sm:$0xff] %v3941_v4  ;;  %2552 = vmatmul.msk.f32.gmra.mxu1 %vm692_vm3, %v299_v38 }
 0x1f7   :  { %1075 = vmatmul.f32.gmra.mxu0 %v296_v5 }
 0x1fa   :  { %1772 = vmatmul.f32.gmra.mxu2 %v1459_v63  ;;  %1837 = vmatmul.f32.gmra.mxu3 %v1396_v42  ;;  %v305_v63 = vld [vmem:[%s4643_s2 + $0x3e8] sm:$0xff]  ;;  %v1471_v42 = vld [vmem:[%s4647_s4 + $0x340] sm:$0xff] }
 0x1fb   :  { %v3966_v35 = vpop.f32.mrf.mxu1 }
 0x1fc   :  { %v3957_v9 = vpop.f32.mrf.mxu0 }
 0x1fd   :  { %v3964_v49 = vpop.f32.mrf.mxu2 }
 0x1fe   :  { %4665 = vst [vmem:[#allocation5_spill] sm:$0xff] %v3964_v49  ;;  %2553 = vmatmul.msk.f32.gmra.mxu1 %vm692_vm3, %v301_v23  ;;  %v4011_v23 = vpop.permute.xlu1 %619 }
 0x1ff   :  { %1078 = vmatmul.f32.gmra.mxu0 %v298_v47  ;;  %v1408_v47 = vld [vmem:[%s4647_s4 + $0x148] sm:$0xff] }
 0x202   :  { %1775 = vmatmul.f32.gmra.mxu2 %v1463_v52  ;;  %1840 = vmatmul.f32.gmra.mxu3 %v1400_v43  ;;  %v4014_v52 = vpop.permute.xlu2 %689 }
 0x203   :  { %v1246_v16 = vpop.f32.mrf.mxu1  ;;  %4669 = vst [vmem:[#allocation9_spill] sm:$0xff] %v4014_v52 }
 0x204   :  { %v1034_v8 = vpop.f32.mrf.mxu0 }
 0x205   :  { %v3983_v33 = vpop.f32.mrf.mxu2  ;;  %v1035_v4 = vadd.f32 %v1034_v8, %v595_v21  ;;  %v1029_v21 = vadd.f32 %v3936_v3, %v3922_v20 }
 0x206   :  { %4666 = vst [vmem:[#allocation6_spill] sm:$0xff] %v3983_v33  ;;  %2554 = vmatmul.msk.f32.gmra.mxu1 %vm692_vm3, %v303_v24 }
 0x207   :  { %1081 = vmatmul.f32.gmra.mxu0 %v300_v51  ;;  %v304_v51 = vld [vmem:[%s4643_s2 + $0x3e0] sm:$0xff]  ;;  %v1244_v8 = vadd.f32 %v3966_v35, %v1035_v4  ;;  %v1238_v20 = vadd.f32 %v3924_v25, %v1029_v21 }
 0x208   :  { %v1483_v4 = vld [vmem:[%s4647_s4 + $0x3a0] sm:$0xff] }
 0x209   :  { %v1347_v3 = vmax.f32 %v1244_v8, 0.0 }
 0x20a   :  { %1778 = vmatmul.f32.gmra.mxu2 %v1467_v54  ;;  %1843 = vmatmul.f32.gmra.mxu3 %v1404_v41  ;;  %v4021_v54 = vpop.permute.xlu0 %669  ;;  %v4040_v33 = vpop.permute.xlu2 %674 }
 0x20b   :  { %v1249_v38 = vpop.f32.mrf.mxu1  ;;  %4671 = vst [vmem:[#allocation11_spill] sm:$0xff] %v4021_v54 }
 0x20c   :  { %v1037_v7 = vpop.f32.mrf.mxu0 }
 0x20d   :  { %v4000_v5 = vpop.f32.mrf.mxu2  ;;  %v1038_v48 = vadd.f32 %v1037_v7, %v600_v27  ;;  %v1032_v27 = vadd.f32 %v3957_v9, %v3962_v28 }
 0x20e   :  { %4668 = vst [vmem:[#allocation8_spill] sm:$0xff] %v4000_v5  ;;  %2555 = vmatmul.msk.f32.gmra.mxu1 %vm692_vm3, %v305_v63  ;;  %v1475_v63 = vld [vmem:[%s4647_s4 + $0x360] sm:$0xff] }
 0x20f   :  { %1084 = vmatmul.f32.gmra.mxu0 %v302_v55  ;;  %v307_v55 = vld [vmem:[%s4643_s2 + $0x3f8] sm:$0xff] }
 0x212   :  { %1781 = vmatmul.f32.gmra.mxu2 %v1471_v42  ;;  %1846 = vmatmul.f32.gmra.mxu3 %v1408_v47  ;;  %v1412_v42 = vld [vmem:[%s4647_s4 + $0x168] sm:$0xff]  ;;  %v4033_v47 = vpop.permute.xlu1 %679 }
 0x213   :  { %v1252_v41 = vpop.f32.mrf.mxu1 }
 0x214   :  { %v1040_v43 = vpop.f32.mrf.mxu0 }
 0x215   :  { %v4019_v24 = vpop.f32.mrf.mxu2  ;;  %v1041_v54 = vadd.f32 %v1040_v43, %v605_v15  ;;  %v1479_v15 = vld [vmem:[%s4647_s4 + $0x380] sm:$0xff]  ;;  %v1416_v43 = vld [vmem:[%s4647_s4 + $0x188] sm:$0xff] }
 0x216   :  { %4670 = vst [vmem:[#allocation10_spill] sm:$0xff] %v4019_v24  ;;  %2556 = vmatmul.msk.f32.gmra.mxu1 %vm692_vm3, %v307_v55 }
 0x217   :  { %1087 = vmatmul.f32.gmra.mxu0 %v304_v51  ;;  %v306_v51 = vld [vmem:[%s4643_s2 + $0x3f0] sm:$0xff]  ;;  %v1250_v18 = vadd.f32 %v1249_v38, %v1041_v54  ;;  %v1026_v54 = vadd.f32 %v3915_v53, %v3943_v46  ;;  %v1420_v53 = vld [vmem:[%s4647_s4 + $0x1a8] sm:$0xff]  ;;  %v4072_v46 = vpop.permute.xlu2 %659 }
 0x219   :  { %v1349_v38 = vmax.f32 %v1250_v18, 0.0  ;;  %v1235_v35 = vadd.f32 %v3899_v10, %v1026_v54 }
 0x21a   :  { %1784 = vmatmul.f32.gmra.mxu2 %v1475_v63  ;;  %1849 = vmatmul.f32.gmra.mxu3 %v1412_v42  ;;  %v4048_v63 = vpop.permute.xlu0 %654  ;;  %v1345_v42 = vmax.f32 %v1238_v20, 0.0 }
 0x21b   :  { %v1255_v49 = vpop.f32.mrf.mxu1 }
 0x21c   :  { %v1043_v52 = vpop.f32.mrf.mxu0 }
 0x21d   :  { %v1044_v24 = vadd.f32 %v1043_v52, %v610_v40  ;;  %v4038_v5 = vpop.f32.mrf.mxu2  ;;  %v1247_v40 = vadd.f32 %v1246_v16, %v1038_v48 }
 0x21f   :  { %v1253_v55 = vadd.f32 %v1252_v41, %v1044_v24  ;;  %1090 = vmatmul.f32.gmra.mxu0 %v306_v51  ;;  %v4055_v24 = vpop.permute.xlu1 %664  ;;  %v1241_v41 = vadd.f32 %v3945_v34, %v1032_v27  ;;  %v1348_v9 = vmax.f32 %v1247_v40, 0.0  ;;  %v1020_v34 = vadd.f32 %v3873_v12, %v3892_v37 }
 0x220   :  { %v1344_v12 = vmax.f32 %v1235_v35, 0.0  ;;  %v1343_v40 = vmax.f32 %v3904_v13, 0.0  ;;  %v1005_v13 = vadd.f32 %v3771_v45, %v3839_v14  ;;  %v1491_v14 = vld [vmem:[%s4647_s4 + $0x3e0] sm:$0xff] }
 0x221   :  { %v1350_v7 = vmax.f32 %v1253_v55, 0.0  ;;  %v1346_v25 = vmax.f32 %v1241_v41, 0.0  ;;  %v1014_v55 = vadd.f32 %v3827_v50, %v3868_v60  ;;  %v1487_v50 = vld [vmem:[%s4647_s4 + $0x3c0] sm:$0xff]  ;;  %v1008_v60 = vadd.f32 %v3791_v22, %v3890_v26 }
 0x222   :  { %1787 = vmatmul.f32.gmra.mxu2 %v1479_v15  ;;  %1852 = vmatmul.f32.gmra.mxu3 %v1416_v43  ;;  %v1229_v15 = vadd.f32 %v3857_v61, %v1020_v34  ;;  %v1424_v61 = vld [vmem:[%s4647_s4 + $0x1c8] sm:$0xff]  ;;  %v1002_v22 = vadd.f32 %v3746_v0, %v3847_v1 }
 0x223   :  { %1913 = vmatpush.msrb.mxu2 %v1350_v7  ;;  %v1258_v48 = vpop.f32.mrf.mxu1  ;;  %v1428_v0 = vld [vmem:[%s4647_s4 + $0x1e8] sm:$0xff] }
 0x224   :  { %v1046_v52 = vpop.f32.mrf.mxu0  ;;  %v1211_v1 = vadd.f32 %v3731_v39, %v1002_v22  ;;  %v1432_v39 = vld [vmem:[%s4647_s4 + $0x208] sm:$0xff] }
 0x225   :  { %v1047_v28 = vadd.f32 %v1046_v52, %v3978_v59  ;;  %v4061_v16 = vpop.f32.mrf.mxu2  ;;  %1914 = vmatpush.msrb.mxu2 %v1349_v38  ;;  %v1017_v59 = vadd.f32 %v3850_v17, %v3913_v44  ;;  %v1011_v17 = vadd.f32 %v3808_v36, %v3871_v57  ;;  %v1223_v36 = vadd.f32 %v3815_v31, %v1014_v55  ;;  %v4104_v57 = vpop.permute.xlu2 %644 }
 0x226   :  { %v1217_v31 = vadd.f32 %v3778_v32, %v1008_v60 }
 0x227   :  { %v4064_v18 = vadd.f32 %v1255_v49, %v1047_v28  ;;  %1915 = vmatpush.msrb.mxu2 %v1348_v9  ;;  %v4077_v49 = vpop.permute.xlu0 %639  ;;  %v4087_v27 = vpop.permute.xlu1 %649  ;;  %v1226_v44 = vadd.f32 %v3834_v62, %v1017_v59  ;;  %v1342_v62 = vmax.f32 %v1229_v15, 0.0  ;;  %v1340_v54 = vmax.f32 %v1223_v36, 0.0  ;;  %v1369_v59 = vld [vmem:[%s4647_s4 + $0x10] sm:$0xff] }
 0x228   :  { %v1214_v9 = vadd.f32 %v3754_v6, %v1005_v13  ;;  %v1338_v28 = vmax.f32 %v1217_v31, 0.0 }
 0x229   :  { %1916 = vmatpush.msrb.mxu2 %v1347_v3  ;;  %v1341_v21 = vmax.f32 %v1226_v44, 0.0  ;;  %v1436_v44 = vld [vmem:[%s4647_s4 + $0x228] sm:$0xff] }
 0x22a   :  { %1790 = vmatmul.f32.gmra.mxu2 %v1483_v4  ;;  %1855 = vmatmul.f32.gmra.mxu3 %v1420_v53  ;;  %v1337_v6 = vmax.f32 %v1214_v9, 0.0  ;;  %v1336_v53 = vmax.f32 %v1211_v1, 0.0 }
 0x22b   :  { %1917 = vmatpush.msrb.mxu2 %v1346_v25  ;;  %v1261_v43 = vpop.f32.mrf.mxu1  ;;  %v1335_v25 = vmax.f32 %v3737_v29, 0.0 }
 0x22c   :  { %v1049_v51 = vpop.f32.mrf.mxu0 }
 0x22d   :  { %v1050_v37 = vadd.f32 %v1049_v51, %v4011_v23  ;;  %v4085_v10 = vpop.f32.mrf.mxu2  ;;  %1918 = vmatpush.msrb.mxu2 %v1345_v42  ;;  %v1220_v23 = vadd.f32 %v3796_v30, %v1011_v17 }
 0x22f   :  { %v4093_v7 = vadd.f32 %v1258_v48, %v1050_v37  ;;  %1919 = vmatpush.msrb.mxu2 %v1344_v12  ;;  %v625_v8 = vpop.permute.xlu0 %624  ;;  %v1339_v30 = vmax.f32 %v1220_v23, 0.0  ;;  %v635_v32 = vpop.permute.xlu1 %634 }
 0x230   :  { %v630_v48 = vpop.permute.xlu2 %629 }
 0x231   :  { %1920 = vmatpush.msrb.mxu2 %v1343_v40  ;;  %v1373_v40 = vld [vmem:[%s4647_s4 + $0x30] sm:$0xff] }
 0x232   :  { %1793 = vmatmul.f32.gmra.mxu2 %v1487_v50  ;;  %1858 = vmatmul.f32.gmra.mxu3 %v1424_v61 }
 0x233   :  { %1921 = vmatpush.msrb.mxu2 %v1342_v62  ;;  %v1264_v41 = vpop.f32.mrf.mxu1 }
 0x234   :  { %v1052_v38 = vpop.f32.mrf.mxu0 }
 0x235   :  { %v1053_v26 = vadd.f32 %v1052_v38, %v625_v8  ;;  %v4112_v52 = vpop.f32.mrf.mxu2  ;;  %1922 = vmatpush.msrb.mxu2 %v1341_v21  ;;  %v1440_v8 = vld [vmem:[%s4647_s4 + $0x248] sm:$0xff]  ;;  %v1377_v38 = vld [vmem:[%s4647_s4 + $0x50] sm:$0xff] }
 0x237   :  { %v4115_v45 = vadd.f32 %v1261_v43, %v1053_v26  ;;  %1923 = vmatpush.msrb.mxu2 %v1340_v54  ;;  %v1530_v42 = vpop.permute.xlu1 %1529 }
 0x238   :  { %v1705_v51 = vadd.f32 %v3813_v11, %v1530_v42  ;;  %v1535_v11 = vpop.permute.xlu2 %1534 }
 0x239   :  { %1924 = vmatpush.msrb.mxu2 %v1339_v30  ;;  %v1708_v50 = vadd.f32 %v3832_v2, %v1535_v11  ;;  %v1540_v2 = vpop.permute.xlu0 %1539 }
 0x23a   :  { %1796 = vmatmul.f32.gmra.mxu2 %v1491_v14  ;;  %1861 = vmatmul.f32.gmra.mxu3 %v1428_v0  ;;  %v1444_v14 = vld [vmem:[%s4647_s4 + $0x268] sm:$0xff]  ;;  %v1381_v0 = vld [vmem:[%s4647_s4 + $0x70] sm:$0xff] }
 0x23b   :  { %1925 = vmatpush.msrb.mxu2 %v1338_v28  ;;  %v1267_v34 = vpop.f32.mrf.mxu1 }
 0x23c   :  { %v1055_v20 = vpop.f32.mrf.mxu0 }
 0x23d   :  { %v1056_v3 = vadd.f32 %v1055_v20, %v630_v48  ;;  %v4124_v4 = vpop.f32.mrf.mxu2  ;;  %1926 = vmatpush.msrb.mxu2 %v1337_v6 }
 0x23f   :  { %v4126_v35 = vadd.f32 %v1264_v41, %v1056_v3  ;;  %1927 = vmatpush.msrb.mxu2 %v1336_v53  ;;  %v1448_v53 = vld [vmem:[%s4647_s4 + $0x288] sm:$0xff] }
 0x241   :  { %1928 = vmatpush.msrb.mxu2 %v1335_v25 }
 0x242   :  { %1864 = vmatmul.f32.gmra.mxu3 %v1432_v39  ;;  %1929 = vmatmul.f32.vlgmr.msrb.gmra.mxu2 %v1369_v59 }
 0x243   :  { %v1270_v43 = vpop.f32.mrf.mxu1 }
 0x244   :  { %v1058_v55 = vpop.f32.mrf.mxu0 }
 0x245   :  { %v1059_v15 = vadd.f32 %v1058_v55, %v635_v32  ;;  %v4136_v12 = vpop.f32.mrf.mxu2  ;;  %v1817_v37 = vpop.f32.mrf.mxu3 }
 0x246   :  { %v4138_v29 = vadd.f32 %v1817_v37, %v1705_v51  ;;  %v1452_v37 = vld [vmem:[%s4647_s4 + $0x2a8] sm:$0xff] }
 0x247   :  { %v4140_v17 = vadd.f32 %v1267_v34, %v1059_v15  ;;  %v1385_v34 = vld [vmem:[%s4647_s4 + $0x90] sm:$0xff] }
 0x24a   :  { %1867 = vmatmul.f32.gmra.mxu3 %v1436_v44  ;;  %1932 = vmatmul.f32.gmra.mxu2 %v1373_v40 }
 0x24b   :  { %v1273_v23 = vpop.f32.mrf.mxu1 }
 0x24c   :  { %v1061_v61 = vpop.f32.mrf.mxu0 }
 0x24d   :  { %v1062_v60 = vadd.f32 %v1061_v61, %v4077_v49  ;;  %v4150_v36 = vpop.f32.mrf.mxu2  ;;  %v1820_v62 = vpop.f32.mrf.mxu3  ;;  %v1711_v49 = vadd.f32 %v3855_v56, %v1540_v2 }
 0x24e   :  { %v4152_v13 = vadd.f32 %v1820_v62, %v1708_v50  ;;  %v1545_v56 = vpop.permute.xlu1 %1544  ;;  %v1456_v62 = vld [vmem:[%s4647_s4 + $0x2c8] sm:$0xff] }
 0x24f   :  { %v4154_v21 = vadd.f32 %v1270_v43, %v1062_v60  ;;  %v4672_v43 = vld [vmem:[#allocation3_spill] sm:$0xff] }
 0x252   :  { %1870 = vmatmul.f32.gmra.mxu3 %v1440_v8  ;;  %1935 = vmatmul.f32.gmra.mxu2 %v1377_v38  ;;  %v4673_v38 = vld [vmem:[#allocation4_spill] sm:$0xff] }
 0x253   :  { %v1276_v9 = vpop.f32.mrf.mxu1 }
 0x254   :  { %v1064_v22 = vpop.f32.mrf.mxu0 }
 0x255   :  { %v1065_v31 = vadd.f32 %v1064_v22, %v4104_v57  ;;  %v4164_v26 = vpop.f32.mrf.mxu2  ;;  %v1823_v54 = vpop.f32.mrf.mxu3  ;;  %v1714_v57 = vadd.f32 %v3878_v19, %v1545_v56 }
 0x256   :  { %v4166_v41 = vadd.f32 %v1823_v54, %v1711_v49  ;;  %v1550_v19 = vpop.permute.xlu2 %1549  ;;  %v1560_v8 = vpop.permute.xlu1 %1559 }
 0x257   :  { %v4168_v30 = vadd.f32 %v1273_v23, %v1065_v31  ;;  %v1393_v23 = vld [vmem:[%s4647_s4 + $0xd0] sm:$0xff]  ;;  %v1723_v2 = vadd.f32 %v4673_v38, %v1560_v8 }
 0x258   :  { %v4676_v8 = vld [vmem:[#allocation8_spill] sm:$0xff] }
 0x25a   :  { %1873 = vmatmul.f32.gmra.mxu3 %v1444_v14  ;;  %1938 = vmatmul.f32.gmra.mxu2 %v1381_v0  ;;  %v1460_v14 = vld [vmem:[%s4647_s4 + $0x2e8] sm:$0xff]  ;;  %v1397_v0 = vld [vmem:[%s4647_s4 + $0xf0] sm:$0xff] }
 0x25b   :  { %v1279_v20 = vpop.f32.mrf.mxu1 }
 0x25c   :  { %v1067_v32 = vpop.f32.mrf.mxu0 }
 0x25d   :  { %v1068_v1 = vadd.f32 %v1067_v32, %v4087_v27  ;;  %v4178_v28 = vpop.f32.mrf.mxu2  ;;  %v1826_v6 = vpop.f32.mrf.mxu3  ;;  %v1717_v27 = vadd.f32 %v3897_v58, %v1550_v19  ;;  %v1389_v58 = vld [vmem:[%s4647_s4 + $0xb0] sm:$0xff]  ;;  %v1464_v19 = vld [vmem:[%s4647_s4 + $0x308] sm:$0xff] }
 0x25e   :  { %v4180_v48 = vadd.f32 %v1826_v6, %v1714_v57  ;;  %v1565_v56 = vpop.permute.xlu2 %1564  ;;  %v4674_v57 = vld [vmem:[#allocation5_spill] sm:$0xff] }
 0x25f   :  { %v4182_v3 = vadd.f32 %v1276_v9, %v1068_v1  ;;  %v1726_v32 = vadd.f32 %v4674_v57, %v1565_v56  ;;  %v1472_v56 = vld [vmem:[%s4647_s4 + $0x348] sm:$0xff]  ;;  %v1409_v57 = vld [vmem:[%s4647_s4 + $0x150] sm:$0xff] }
 0x262   :  { %1876 = vmatmul.f32.gmra.mxu3 %v1448_v53  ;;  %1941 = vmatmul.f32.gmra.mxu2 %v1385_v34 }
 0x263   :  { %v4196_v55 = vpop.f32.mrf.mxu1 }
 0x264   :  { %v1070_v25 = vpop.f32.mrf.mxu0 }
 0x265   :  { %v1071_v39 = vadd.f32 %v1070_v25, %v4048_v63  ;;  %v4192_v59 = vpop.f32.mrf.mxu2  ;;  %v1829_v42 = vpop.f32.mrf.mxu3 }
 0x266   :  { %v4194_v51 = vadd.f32 %v1829_v42, %v1717_v27  ;;  %v1555_v63 = vpop.permute.xlu0 %1554  ;;  %v1401_v27 = vld [vmem:[%s4647_s4 + $0x110] sm:$0xff] }
 0x267   :  { %v4198_v15 = vadd.f32 %v1279_v20, %v1071_v39  ;;  %v1720_v44 = vadd.f32 %v4672_v43, %v1555_v63  ;;  %v4675_v39 = vld [vmem:[#allocation6_spill] sm:$0xff] }
 0x26a   :  { %1879 = vmatmul.f32.gmra.mxu3 %v1452_v37  ;;  %1944 = vmatmul.f32.gmra.mxu2 %v1389_v58 }
 0x26b   :  { %v4213_v60 = vpop.f32.mrf.mxu1 }
 0x26c   :  { %v4207_v40 = vpop.f32.mrf.mxu0 }
 0x26d   :  { %v4209_v11 = vpop.f32.mrf.mxu2  ;;  %v1832_v50 = vpop.f32.mrf.mxu3 }
 0x26e   :  { %v4211_v61 = vadd.f32 %v1832_v50, %v1720_v44  ;;  %v1570_v25 = vpop.permute.xlu0 %1569  ;;  %v1468_v44 = vld [vmem:[%s4647_s4 + $0x328] sm:$0xff]  ;;  %v1405_v50 = vld [vmem:[%s4647_s4 + $0x130] sm:$0xff] }
 0x26f   :  { %v1729_v42 = vadd.f32 %v4675_v39, %v1570_v25 }
 0x272   :  { %1882 = vmatmul.f32.gmra.mxu3 %v1456_v62  ;;  %1947 = vmatmul.f32.gmra.mxu2 %v1393_v23  ;;  %v1575_v23 = vpop.permute.xlu1 %1574 }
 0x273   :  { %v4228_v9 = vpop.f32.mrf.mxu1  ;;  %v1732_v38 = vadd.f32 %v4676_v8, %v1575_v23  ;;  %v4681_v8 = vld [vmem:[#allocation7_spill] sm:$0xff] }
 0x274   :  { %v4222_v49 = vpop.f32.mrf.mxu0 }
 0x275   :  { %v4224_v22 = vpop.f32.mrf.mxu2  ;;  %v1835_v31 = vpop.f32.mrf.mxu3 }
 0x276   :  { %v4226_v54 = vadd.f32 %v1835_v31, %v1723_v2  ;;  %v1585_v23 = vpop.permute.xlu0 %1584 }
 0x27a   :  { %1885 = vmatmul.f32.gmra.mxu3 %v1460_v14  ;;  %1950 = vmatmul.f32.gmra.mxu2 %v1397_v0 }
 0x27b   :  { %v1291_v34 = vpop.f32.mrf.mxu1 }
 0x27c   :  { %v1079_v1 = vpop.f32.mrf.mxu0 }
 0x27d   :  { %v4237_v6 = vpop.f32.mrf.mxu2  ;;  %v1838_v20 = vpop.f32.mrf.mxu3 }
 0x27e   :  { %v4239_v53 = vadd.f32 %v1838_v20, %v1726_v32  ;;  %v1580_v20 = vpop.permute.xlu2 %1579 }
 0x282   :  { %1888 = vmatmul.f32.gmra.mxu3 %v1464_v19  ;;  %1953 = vmatmul.f32.gmra.mxu2 %v1401_v27  ;;  %v4678_v19 = vld [vmem:[#allocation10_spill] sm:$0xff] }
 0x283   :  { %v1294_v62 = vpop.f32.mrf.mxu1  ;;  %v1735_v27 = vadd.f32 %v4678_v19, %v1580_v20  ;;  %v4682_v19 = vld [vmem:[#allocation9_spill] sm:$0xff] }
 0x284   :  { %v1082_v37 = vpop.f32.mrf.mxu0 }
 0x285   :  { %v4248_v58 = vpop.f32.mrf.mxu2  ;;  %v1841_v63 = vpop.f32.mrf.mxu3 }
 0x286   :  { %v4250_v43 = vadd.f32 %v1841_v63, %v1729_v42 }
 0x28a   :  { %1891 = vmatmul.f32.gmra.mxu3 %v1468_v44  ;;  %1956 = vmatmul.f32.gmra.mxu2 %v1405_v50  ;;  %v1476_v44 = vld [vmem:[%s4647_s4 + $0x368] sm:$0xff]  ;;  %v1413_v50 = vld [vmem:[%s4647_s4 + $0x170] sm:$0xff] }
 0x28b   :  { %v1297_v32 = vpop.f32.mrf.mxu1 }
 0x28c   :  { %v1085_v2 = vpop.f32.mrf.mxu0 }
 0x28d   :  { %v4259_v31 = vpop.f32.mrf.mxu2  ;;  %v1844_v14 = vpop.f32.mrf.mxu3  ;;  %v1086_v20 = vadd.f32 %v1085_v2, %v4033_v47  ;;  %v4683_v47 = vld [vmem:[#allocation11_spill] sm:$0xff] }
 0x28e   :  { %v4261_v0 = vadd.f32 %v1844_v14, %v1732_v38  ;;  %v1738_v14 = vadd.f32 %v4038_v5, %v1585_v23  ;;  %v1417_v5 = vld [vmem:[%s4647_s4 + $0x190] sm:$0xff]  ;;  %v1080_v2 = vadd.f32 %v1079_v1, %v4683_v47  ;;  %v1600_v47 = vpop.permute.xlu0 %1599 }
 0x28f   :  { %v1295_v23 = vadd.f32 %v1294_v62, %v1086_v20 }
 0x290   :  { %4677 = vst [vmem:[#allocation3_spill] sm:$0xff] %v4261_v0  ;;  %v1083_v0 = vadd.f32 %v1082_v37, %v4040_v33  ;;  %v1077_v33 = vadd.f32 %v4222_v49, %v4055_v24 }
 0x292   :  { %1894 = vmatmul.f32.gmra.mxu3 %v1472_v56  ;;  %1959 = vmatmul.f32.gmra.mxu2 %v1409_v57  ;;  %v1292_v37 = vadd.f32 %v1291_v34, %v1083_v0 }
 0x293   :  { %v1300_v57 = vpop.f32.mrf.mxu1 }
 0x294   :  { %v1088_v25 = vpop.f32.mrf.mxu0  ;;  %v1363_v24 = vmax.f32 %v1292_v37, 0.0  ;;  %v1355_v37 = vmax.f32 %v4140_v17, 0.0 }
 0x295   :  { %v4270_v39 = vpop.f32.mrf.mxu2  ;;  %v1847_v42 = vpop.f32.mrf.mxu3  ;;  %v1089_v38 = vadd.f32 %v1088_v25, %v4681_v8  ;;  %v1480_v25 = vld [vmem:[%s4647_s4 + $0x388] sm:$0xff] }
 0x296   :  { %4679 = vst [vmem:[#allocation4_spill] sm:$0xff] %v4270_v39  ;;  %v4272_v63 = vadd.f32 %v1847_v42, %v1735_v27 }
 0x298   :  { %4680 = vst [vmem:[#allocation5_spill] sm:$0xff] %v4272_v63 }
 0x29a   :  { %1897 = vmatmul.f32.gmra.mxu3 %v1476_v44  ;;  %1962 = vmatmul.f32.gmra.mxu2 %v1413_v50  ;;  %v1298_v44 = vadd.f32 %v1297_v32, %v1089_v38 }
 0x29c   :  { %v1091_v56 = vpop.f32.mrf.mxu0  ;;  %v1365_v32 = vmax.f32 %v1298_v44, 0.0 }
 0x29d   :  { %v1092_v27 = vadd.f32 %v1091_v56, %v4682_v19  ;;  %v4284_v42 = vpop.f32.mrf.mxu2  ;;  %v1850_v63 = vpop.f32.mrf.mxu3  ;;  %v1289_v56 = vadd.f32 %v4228_v9, %v1080_v2  ;;  %v1286_v19 = vadd.f32 %v4213_v60, %v1077_v33  ;;  %v1357_v2 = vmax.f32 %v4168_v30, 0.0  ;;  %v1429_v30 = vld [vmem:[%s4647_s4 + $0x1f0] sm:$0xff] }
 0x29e   :  { %v4286_v39 = vadd.f32 %v1850_v63, %v1738_v14  ;;  %v1590_v63 = vpop.permute.xlu1 %1589  ;;  %v1074_v14 = vadd.f32 %v4207_v40, %v4072_v46  ;;  %v1421_v46 = vld [vmem:[%s4647_s4 + $0x1b0] sm:$0xff]  ;;  %v1595_v9 = vpop.permute.xlu2 %1594 }
 0x29f   :  { %v1301_v50 = vadd.f32 %v1300_v57, %v1092_v27  ;;  %v1741_v38 = vadd.f32 %v4061_v16, %v1590_v63  ;;  %v1364_v57 = vmax.f32 %v1295_v23, 0.0  ;;  %v1484_v16 = vld [vmem:[%s4647_s4 + $0x3a8] sm:$0xff]  ;;  %v1362_v49 = vmax.f32 %v1289_v56, 0.0 }
 0x2a0   :  { %v1283_v40 = vadd.f32 %v4196_v55, %v1074_v14  ;;  %v1361_v34 = vmax.f32 %v1286_v19, 0.0  ;;  %v1744_v60 = vadd.f32 %v4085_v10, %v1595_v9  ;;  %v1488_v55 = vld [vmem:[%s4647_s4 + $0x3c8] sm:$0xff]  ;;  %v1358_v10 = vmax.f32 %v4182_v3, 0.0 }
 0x2a1   :  { %v1366_v8 = vmax.f32 %v1301_v50, 0.0  ;;  %v1356_v23 = vmax.f32 %v4154_v21, 0.0  ;;  %v1492_v3 = vld [vmem:[%s4647_s4 + $0x3e8] sm:$0xff] }
 0x2a2   :  { %1900 = vmatmul.f32.gmra.mxu3 %v1480_v25  ;;  %1965 = vmatmul.f32.gmra.mxu2 %v1417_v5  ;;  %v1360_v0 = vmax.f32 %v1283_v40, 0.0  ;;  %v1359_v25 = vmax.f32 %v4198_v15, 0.0  ;;  %v1425_v5 = vld [vmem:[%s4647_s4 + $0x1d0] sm:$0xff]  ;;  %v1747_v15 = vadd.f32 %v4112_v52, %v1600_v47  ;;  %v1354_v52 = vmax.f32 %v4126_v35, 0.0  ;;  %v1374_v40 = vld [vmem:[%s4647_s4 + $0x38] sm:$0xff] }
 0x2a3   :  { %2026 = vmatpush.msrb.mxu3 %v1366_v8  ;;  %v1433_v35 = vld [vmem:[%s4647_s4 + $0x210] sm:$0xff] }
 0x2a4   :  { %v1445_v47 = vld [vmem:[%s4647_s4 + $0x270] sm:$0xff] }
 0x2a5   :  { %v4302_v1 = vpop.f32.mrf.mxu2  ;;  %v1853_v62 = vpop.f32.mrf.mxu3  ;;  %2027 = vmatpush.msrb.mxu3 %v1365_v32  ;;  %v1353_v32 = vmax.f32 %v4115_v45, 0.0  ;;  %v1370_v45 = vld [vmem:[%s4647_s4 + $0x18] sm:$0xff] }
 0x2a6   :  { %v4304_v20 = vadd.f32 %v1853_v62, %v1741_v38  ;;  %v1605_v21 = vpop.permute.xlu1 %1604  ;;  %v1352_v38 = vmax.f32 %v4093_v7, 0.0  ;;  %v1351_v62 = vmax.f32 %v4064_v18, 0.0  ;;  %v1610_v7 = vpop.permute.xlu2 %1609 }
 0x2a7   :  { %2028 = vmatpush.msrb.mxu3 %v1364_v57  ;;  %v1750_v17 = vadd.f32 %v4124_v4, %v1605_v21  ;;  %v1753_v4 = vadd.f32 %v4136_v12, %v1610_v7 }
 0x2a9   :  { %2029 = vmatpush.msrb.mxu3 %v1363_v24 }
 0x2aa   :  { %1903 = vmatmul.f32.gmra.mxu3 %v1484_v16  ;;  %1968 = vmatmul.f32.gmra.mxu2 %v1421_v46  ;;  %v1437_v46 = vld [vmem:[%s4647_s4 + $0x230] sm:$0xff] }
 0x2ab   :  { %2030 = vmatpush.msrb.mxu3 %v1362_v49  ;;  %v1615_v49 = vpop.permute.xlu0 %1614 }
 0x2ac   :  { %v1756_v12 = vadd.f32 %v4150_v36, %v1615_v49 }
 0x2ad   :  { %v4315_v27 = vpop.f32.mrf.mxu2  ;;  %v1856_v44 = vpop.f32.mrf.mxu3  ;;  %2031 = vmatpush.msrb.mxu3 %v1361_v34 }
 0x2ae   :  { %v4317_v50 = vadd.f32 %v1856_v44, %v1744_v60  ;;  %v1378_v44 = vld [vmem:[%s4647_s4 + $0x58] sm:$0xff] }
 0x2af   :  { %2032 = vmatpush.msrb.mxu3 %v1360_v0  ;;  %v1441_v0 = vld [vmem:[%s4647_s4 + $0x250] sm:$0xff] }
 0x2b1   :  { %2033 = vmatpush.msrb.mxu3 %v1359_v25  ;;  %v1620_v25 = vpop.permute.xlu1 %1619 }
 0x2b2   :  { %1906 = vmatmul.f32.gmra.mxu3 %v1488_v55  ;;  %1971 = vmatmul.f32.gmra.mxu2 %v1425_v5  ;;  %v1759_v36 = vadd.f32 %v4164_v26, %v1620_v25 }
 0x2b3   :  { %2034 = vmatpush.msrb.mxu3 %v1358_v10 }
 0x2b5   :  { %v4330_v8 = vpop.f32.mrf.mxu2  ;;  %v1859_v63 = vpop.f32.mrf.mxu3  ;;  %2035 = vmatpush.msrb.mxu3 %v1357_v2  ;;  %v1382_v2 = vld [vmem:[%s4647_s4 + $0x78] sm:$0xff] }
 0x2b6   :  { %v4332_v33 = vadd.f32 %v1859_v63, %v1747_v15  ;;  %v1625_v15 = vpop.permute.xlu2 %1624 }
 0x2b7   :  { %2036 = vmatpush.msrb.mxu3 %v1356_v23  ;;  %v1762_v26 = vadd.f32 %v4178_v28, %v1625_v15 }
 0x2b9   :  { %2037 = vmatpush.msrb.mxu3 %v1355_v37 }
 0x2ba   :  { %1909 = vmatmul.f32.gmra.mxu3 %v1492_v3  ;;  %1974 = vmatmul.f32.gmra.mxu2 %v1429_v30  ;;  %v1449_v3 = vld [vmem:[%s4647_s4 + $0x290] sm:$0xff]  ;;  %v1386_v30 = vld [vmem:[%s4647_s4 + $0x98] sm:$0xff] }
 0x2bb   :  { %2038 = vmatpush.msrb.mxu3 %v1354_v52  ;;  %v1630_v52 = vpop.permute.xlu0 %1629 }
 0x2bc   :  { %v1765_v28 = vadd.f32 %v4192_v59, %v1630_v52 }
 0x2bd   :  { %v4345_v14 = vpop.f32.mrf.mxu2  ;;  %v1862_v56 = vpop.f32.mrf.mxu3  ;;  %2039 = vmatpush.msrb.mxu3 %v1353_v32 }
 0x2be   :  { %v4347_v57 = vadd.f32 %v1862_v56, %v1750_v17  ;;  %v1390_v56 = vld [vmem:[%s4647_s4 + $0xb8] sm:$0xff] }
 0x2bf   :  { %2040 = vmatpush.msrb.mxu3 %v1352_v38  ;;  %v1453_v38 = vld [vmem:[%s4647_s4 + $0x2b0] sm:$0xff] }
 0x2c1   :  { %2041 = vmatpush.msrb.mxu3 %v1351_v62  ;;  %v1635_v62 = vpop.permute.xlu1 %1634 }
 0x2c2   :  { %1977 = vmatmul.f32.gmra.mxu2 %v1433_v35  ;;  %2042 = vmatmul.f32.vlgmr.msrb.gmra.mxu3 %v1370_v45  ;;  %v1768_v59 = vadd.f32 %v4209_v11, %v1635_v62 }
 0x2c5   :  { %v1865_v19 = vpop.f32.mrf.mxu3  ;;  %v1930_v24 = vpop.f32.mrf.mxu2 }
 0x2c6   :  { %v4357_v16 = vadd.f32 %v1865_v19, %v1753_v4  ;;  %v4360_v18 = vadd.f32 %v1930_v24, %v4138_v29  ;;  %v1457_v4 = vld [vmem:[%s4647_s4 + $0x2d0] sm:$0xff]  ;;  %v1394_v19 = vld [vmem:[%s4647_s4 + $0xd8] sm:$0xff]  ;;  %v1640_v24 = vpop.permute.xlu2 %1639 }
 0x2c7   :  { %v1771_v11 = vadd.f32 %v4224_v22, %v1640_v24  ;;  %v1414_v24 = vld [vmem:[%s4647_s4 + $0x178] sm:$0xff] }
 0x2ca   :  { %1980 = vmatmul.f32.gmra.mxu2 %v1437_v46  ;;  %2045 = vmatmul.f32.gmra.mxu3 %v1374_v40 }
 0x2cd   :  { %v1868_v9 = vpop.f32.mrf.mxu3  ;;  %v1933_v34 = vpop.f32.mrf.mxu2 }
 0x2ce   :  { %v4369_v60 = vadd.f32 %v1868_v9, %v1756_v12  ;;  %v4372_v29 = vadd.f32 %v1933_v34, %v4152_v13  ;;  %v1461_v12 = vld [vmem:[%s4647_s4 + $0x2f0] sm:$0xff]  ;;  %v1398_v9 = vld [vmem:[%s4647_s4 + $0xf8] sm:$0xff]  ;;  %v1645_v34 = vpop.permute.xlu0 %1644 }
 0x2cf   :  { %v1774_v22 = vadd.f32 %v4237_v6, %v1645_v34 }
 0x2d2   :  { %1983 = vmatmul.f32.gmra.mxu2 %v1441_v0  ;;  %2048 = vmatmul.f32.gmra.mxu3 %v1378_v44 }
 0x2d5   :  { %v1871_v55 = vpop.f32.mrf.mxu3  ;;  %v1936_v5 = vpop.f32.mrf.mxu2 }
 0x2d6   :  { %v4381_v10 = vadd.f32 %v1871_v55, %v1759_v36  ;;  %v4384_v13 = vadd.f32 %v1936_v5, %v4166_v41  ;;  %v1465_v36 = vld [vmem:[%s4647_s4 + $0x310] sm:$0xff]  ;;  %v1402_v55 = vld [vmem:[%s4647_s4 + $0x118] sm:$0xff]  ;;  %v1650_v5 = vpop.permute.xlu1 %1649 }
 0x2d7   :  { %v1777_v6 = vadd.f32 %v4248_v58, %v1650_v5 }
 0x2da   :  { %1986 = vmatmul.f32.gmra.mxu2 %v1445_v47  ;;  %2051 = vmatmul.f32.gmra.mxu3 %v1382_v2 }
 0x2dd   :  { %v1874_v23 = vpop.f32.mrf.mxu3  ;;  %v1939_v63 = vpop.f32.mrf.mxu2 }
 0x2de   :  { %v4393_v37 = vadd.f32 %v1874_v23, %v1762_v26  ;;  %v4396_v41 = vadd.f32 %v1939_v63, %v4180_v48  ;;  %v1469_v26 = vld [vmem:[%s4647_s4 + $0x330] sm:$0xff]  ;;  %v1406_v23 = vld [vmem:[%s4647_s4 + $0x138] sm:$0xff]  ;;  %v1655_v63 = vpop.permute.xlu2 %1654 }
 0x2df   :  { %v1780_v58 = vadd.f32 %v4259_v31, %v1655_v63 }
 0x2e2   :  { %1989 = vmatmul.f32.gmra.mxu2 %v1449_v3  ;;  %2054 = vmatmul.f32.gmra.mxu3 %v1386_v30 }
 0x2e5   :  { %v1877_v21 = vpop.f32.mrf.mxu3  ;;  %v1942_v32 = vpop.f32.mrf.mxu2 }
 0x2e6   :  { %v4405_v17 = vadd.f32 %v1877_v21, %v1765_v28  ;;  %v4408_v48 = vadd.f32 %v1942_v32, %v4194_v51  ;;  %v4684_v28 = vld [vmem:[#allocation3_spill] sm:$0xff]  ;;  %v1473_v21 = vld [vmem:[%s4647_s4 + $0x350] sm:$0xff]  ;;  %v1410_v32 = vld [vmem:[%s4647_s4 + $0x158] sm:$0xff] }
 0x2ea   :  { %1992 = vmatmul.f32.gmra.mxu2 %v1453_v38  ;;  %2057 = vmatmul.f32.gmra.mxu3 %v1390_v56  ;;  %v1660_v38 = vpop.permute.xlu0 %1659  ;;  %v4685_v56 = vld [vmem:[#allocation4_spill] sm:$0xff] }
 0x2eb   :  { %v1783_v31 = vadd.f32 %v4685_v56, %v1660_v38  ;;  %v1493_v38 = vld [vmem:[%s4647_s4 + $0x3f0] sm:$0xff]  ;;  %v1430_v56 = vld [vmem:[%s4647_s4 + $0x1f8] sm:$0xff] }
 0x2ed   :  { %v1880_v35 = vpop.f32.mrf.mxu3  ;;  %v1945_v45 = vpop.f32.mrf.mxu2 }
 0x2ee   :  { %v4417_v7 = vadd.f32 %v1880_v35, %v1768_v59  ;;  %v4420_v51 = vadd.f32 %v1945_v45, %v4211_v61  ;;  %v4686_v45 = vld [vmem:[#allocation5_spill] sm:$0xff] }
 0x2f2   :  { %1995 = vmatmul.f32.gmra.mxu2 %v1457_v4  ;;  %2060 = vmatmul.f32.gmra.mxu3 %v1394_v19  ;;  %v1477_v19 = vld [vmem:[%s4647_s4 + $0x370] sm:$0xff] }
 0x2f5   :  { %v1883_v46 = vpop.f32.mrf.mxu3  ;;  %v1948_v40 = vpop.f32.mrf.mxu2 }
 0x2f6   :  { %v4429_v49 = vadd.f32 %v1883_v46, %v1771_v11  ;;  %v4432_v61 = vadd.f32 %v1948_v40, %v4226_v54  ;;  %v1665_v11 = vpop.permute.xlu1 %1664 }
 0x2f7   :  { %v1786_v46 = vadd.f32 %v4284_v42, %v1665_v11 }
 0x2fa   :  { %1998 = vmatmul.f32.gmra.mxu2 %v1461_v12  ;;  %2063 = vmatmul.f32.gmra.mxu3 %v1398_v9 }
 0x2fd   :  { %v1886_v0 = vpop.f32.mrf.mxu3  ;;  %v1951_v44 = vpop.f32.mrf.mxu2 }
 0x2fe   :  { %v4441_v25 = vadd.f32 %v1886_v0, %v1774_v22  ;;  %v4444_v54 = vadd.f32 %v1951_v44, %v4239_v53  ;;  %v1481_v22 = vld [vmem:[%s4647_s4 + $0x390] sm:$0xff]  ;;  %v1418_v0 = vld [vmem:[%s4647_s4 + $0x198] sm:$0xff]  ;;  %v1670_v44 = vpop.permute.xlu2 %1669 }
 0x2ff   :  { %v1789_v42 = vadd.f32 %v4302_v1, %v1670_v44 }
 0x302   :  { %2001 = vmatmul.f32.gmra.mxu2 %v1465_v36  ;;  %2066 = vmatmul.f32.gmra.mxu3 %v1402_v55 }
 0x305   :  { %v1889_v47 = vpop.f32.mrf.mxu3  ;;  %v1954_v2 = vpop.f32.mrf.mxu2 }
 0x306   :  { %v4453_v15 = vadd.f32 %v1889_v47, %v1777_v6  ;;  %v4456_v53 = vadd.f32 %v1954_v2, %v4250_v43  ;;  %v1485_v6 = vld [vmem:[%s4647_s4 + $0x3b0] sm:$0xff]  ;;  %v1422_v47 = vld [vmem:[%s4647_s4 + $0x1b8] sm:$0xff]  ;;  %v1675_v2 = vpop.permute.xlu0 %1674 }
 0x307   :  { %v1792_v1 = vadd.f32 %v4315_v27, %v1675_v2 }
 0x30a   :  { %2004 = vmatmul.f32.gmra.mxu2 %v1469_v26  ;;  %2069 = vmatmul.f32.gmra.mxu3 %v1406_v23 }
 0x30d   :  { %v1892_v3 = vpop.f32.mrf.mxu3  ;;  %v1957_v30 = vpop.f32.mrf.mxu2 }
 0x30e   :  { %v4465_v52 = vadd.f32 %v1892_v3, %v1780_v58  ;;  %v4468_v43 = vadd.f32 %v1957_v30, %v4684_v28  ;;  %v1489_v58 = vld [vmem:[%s4647_s4 + $0x3d0] sm:$0xff]  ;;  %v1426_v3 = vld [vmem:[%s4647_s4 + $0x1d8] sm:$0xff]  ;;  %v1680_v30 = vpop.permute.xlu1 %1679 }
 0x30f   :  { %v1795_v27 = vadd.f32 %v4330_v8, %v1680_v30 }
 0x312   :  { %2007 = vmatmul.f32.gmra.mxu2 %v1473_v21  ;;  %2072 = vmatmul.f32.gmra.mxu3 %v1410_v32 }
 0x315   :  { %v1895_v62 = vpop.f32.mrf.mxu3  ;;  %v1960_v59 = vpop.f32.mrf.mxu2 }
 0x316   :  { %v4477_v35 = vadd.f32 %v1895_v62, %v1783_v31  ;;  %v4480_v4 = vadd.f32 %v1960_v59, %v4686_v45  ;;  %v1685_v31 = vpop.permute.xlu2 %1684 }
 0x317   :  { %v1798_v8 = vadd.f32 %v4345_v14, %v1685_v31  ;;  %v1438_v14 = vld [vmem:[%s4647_s4 + $0x238] sm:$0xff] }
 0x31a   :  { %2010 = vmatmul.f32.gmra.mxu2 %v1477_v19  ;;  %2075 = vmatmul.f32.gmra.mxu3 %v1414_v24  ;;  %v1434_v19 = vld [vmem:[%s4647_s4 + $0x218] sm:$0xff] }
 0x31d   :  { %v1898_v40 = vpop.f32.mrf.mxu3  ;;  %v1963_v12 = vpop.f32.mrf.mxu2 }
 0x31e   :  { %v4489_v9 = vadd.f32 %v1898_v40, %v1786_v46  ;;  %v4492_v34 = vadd.f32 %v1963_v12, %v4286_v39 }
 0x322   :  { %2013 = vmatmul.f32.gmra.mxu2 %v1481_v22  ;;  %2078 = vmatmul.f32.gmra.mxu3 %v1418_v0 }
 0x325   :  { %v1901_v36 = vpop.f32.mrf.mxu3  ;;  %v1966_v55 = vpop.f32.mrf.mxu2 }
 0x326   :  { %v4501_v5 = vadd.f32 %v1901_v36, %v1789_v42  ;;  %v4504_v39 = vadd.f32 %v1966_v55, %v4304_v20  ;;  %v2206_v36 = vpop.permute.xlu0 %2205 }
 0x32a   :  { %2016 = vmatmul.f32.gmra.mxu2 %v1485_v6  ;;  %2081 = vmatmul.f32.gmra.mxu3 %v1422_v47 }
 0x32d   :  { %v1904_v26 = vpop.f32.mrf.mxu3  ;;  %v1969_v23 = vpop.f32.mrf.mxu2 }
 0x32e   :  { %v4513_v63 = vadd.f32 %v1904_v26, %v1792_v1  ;;  %v4516_v20 = vadd.f32 %v1969_v23, %v4317_v50 }
 0x332   :  { %2019 = vmatmul.f32.gmra.mxu2 %v1489_v58  ;;  %2084 = vmatmul.f32.gmra.mxu3 %v1426_v3  ;;  %v2216_v58 = vpop.permute.xlu2 %2215 }
 0x335   :  { %v1907_v28 = vpop.f32.mrf.mxu3  ;;  %v1972_v21 = vpop.f32.mrf.mxu2 }
 0x336   :  { %v4525_v32 = vadd.f32 %v1907_v28, %v1795_v27  ;;  %v4528_v50 = vadd.f32 %v1972_v21, %v4332_v33 }
 0x33a   :  { %2022 = vmatmul.f32.gmra.mxu2 %v1493_v38  ;;  %2087 = vmatmul.f32.gmra.mxu3 %v1430_v56  ;;  %v2221_v56 = vpop.permute.xlu0 %2220 }
 0x33d   :  { %v1910_v62 = vpop.f32.mrf.mxu3  ;;  %v1975_v59 = vpop.f32.mrf.mxu2 }
 0x33e   :  { %v4537_v45 = vadd.f32 %v1910_v62, %v1798_v8  ;;  %v4540_v33 = vadd.f32 %v1975_v59, %v4347_v57 }
 0x342   :  { %2090 = vmatmul.f32.gmra.mxu3 %v1434_v19 }
 0x345   :  { %v1978_v24 = vpop.f32.mrf.mxu2  ;;  %v2043_v11 = vpop.f32.mrf.mxu3 }
 0x346   :  { %v4546_v46 = vadd.f32 %v1978_v24, %v4357_v16  ;;  %v2044_v40 = vadd.f32 %v2043_v11, %v4360_v18  ;;  %v1442_v16 = vld [vmem:[%s4647_s4 + $0x258] sm:$0xff]  ;;  %v2211_v18 = vpop.permute.xlu1 %2210 }
 0x348   :  { %v2139_v22 = vmax.f32 %v2044_v40, 0.0 }
 0x34a   :  { %2093 = vmatmul.f32.gmra.mxu3 %v1438_v14  ;;  %v2363_v55 = vmul.f32 %v2206_v36, %v2139_v22  ;;  %v1458_v22 = vld [vmem:[%s4647_s4 + $0x2d8] sm:$0xff] }
 0x34d   :  { %v1981_v12 = vpop.f32.mrf.mxu2  ;;  %v2046_v57 = vpop.f32.mrf.mxu3 }
 0x34e   :  { %v4553_v0 = vadd.f32 %v1981_v12, %v4369_v60  ;;  %v2047_v44 = vadd.f32 %v2046_v57, %v4372_v29  ;;  %v1446_v29 = vld [vmem:[%s4647_s4 + $0x278] sm:$0xff]  ;;  %v2226_v11 = vpop.permute.xlu1 %2225 }
 0x350   :  { %v2140_v42 = vmax.f32 %v2047_v44, 0.0  ;;  %v2231_v44 = vpop.permute.xlu2 %2230 }
 0x352   :  { %v2364_v6 = vmul.f32 %v2211_v18, %v2140_v42  ;;  %2096 = vmatmul.f32.gmra.mxu3 %v1442_v16  ;;  %v1462_v18 = vld [vmem:[%s4647_s4 + $0x2f8] sm:$0xff] }
 0x354   :  { %v2395_v47 = vadd.f32 %v2364_v6, %v2363_v55  ;;  %v2236_v6 = vpop.permute.xlu0 %2235 }
 0x355   :  { %v1984_v2 = vpop.f32.mrf.mxu2  ;;  %v2049_v1 = vpop.f32.mrf.mxu3 }
 0x356   :  { %v4560_v26 = vadd.f32 %v1984_v2, %v4381_v10  ;;  %v2050_v60 = vadd.f32 %v2049_v1, %v4384_v13  ;;  %v1450_v10 = vld [vmem:[%s4647_s4 + $0x298] sm:$0xff] }
 0x358   :  { %v2141_v23 = vmax.f32 %v2050_v60, 0.0  ;;  %v1466_v60 = vld [vmem:[%s4647_s4 + $0x318] sm:$0xff] }
 0x35a   :  { %v2365_v3 = vmul.f32 %v2216_v58, %v2141_v23  ;;  %2099 = vmatmul.f32.gmra.mxu3 %v1446_v29  ;;  %v2241_v23 = vpop.permute.xlu1 %2240 }
 0x35c   :  { %v2396_v30 = vadd.f32 %v2395_v47, %v2365_v3 }
 0x35d   :  { %v1987_v27 = vpop.f32.mrf.mxu2  ;;  %v2052_v28 = vpop.f32.mrf.mxu3 }
 0x35e   :  { %v4567_v21 = vadd.f32 %v1987_v27, %v4393_v37  ;;  %v2053_v38 = vadd.f32 %v2052_v28, %v4396_v41  ;;  %v1454_v37 = vld [vmem:[%s4647_s4 + $0x2b8] sm:$0xff] }
 0x35f   :  { %v1470_v27 = vld [vmem:[%s4647_s4 + $0x338] sm:$0xff] }
 0x360   :  { %v2142_v13 = vmax.f32 %v2053_v38, 0.0  ;;  %v2246_v38 = vpop.permute.xlu2 %2245 }
 0x362   :  { %v2366_v31 = vmul.f32 %v2221_v56, %v2142_v13  ;;  %2102 = vmatmul.f32.gmra.mxu3 %v1450_v10 }
 0x364   :  { %v2397_v8 = vadd.f32 %v2396_v30, %v2366_v31  ;;  %v1474_v31 = vld [vmem:[%s4647_s4 + $0x358] sm:$0xff] }
 0x365   :  { %v1990_v62 = vpop.f32.mrf.mxu2  ;;  %v2055_v59 = vpop.f32.mrf.mxu3 }
 0x366   :  { %v4574_v19 = vadd.f32 %v1990_v62, %v4405_v17  ;;  %v2056_v24 = vadd.f32 %v2055_v59, %v4408_v48  ;;  %v2251_v62 = vpop.permute.xlu0 %2250 }
 0x368   :  { %v2143_v41 = vmax.f32 %v2056_v24, 0.0 }
 0x36a   :  { %v2367_v40 = vmul.f32 %v2226_v11, %v2143_v41  ;;  %2105 = vmatmul.f32.gmra.mxu3 %v1454_v37  ;;  %v1478_v41 = vld [vmem:[%s4647_s4 + $0x378] sm:$0xff] }
 0x36c   :  { %v2398_v14 = vadd.f32 %v2397_v8, %v2367_v40  ;;  %v2256_v40 = vpop.permute.xlu1 %2255 }
 0x36d   :  { %v2058_v12 = vpop.f32.mrf.mxu3 }
 0x36e   :  { %v2059_v57 = vadd.f32 %v2058_v12, %v4420_v51 }
 0x370   :  { %v2144_v17 = vmax.f32 %v2059_v57, 0.0 }
 0x372   :  { %v2368_v16 = vmul.f32 %v2231_v44, %v2144_v17  ;;  %2108 = vmatmul.f32.gmra.mxu3 %v1458_v22  ;;  %v1482_v22 = vld [vmem:[%s4647_s4 + $0x398] sm:$0xff]  ;;  %v2261_v44 = vpop.permute.xlu2 %2260 }
 0x374   :  { %v2399_v48 = vadd.f32 %v2398_v14, %v2368_v16 }
 0x375   :  { %v2061_v42 = vpop.f32.mrf.mxu3 }
 0x376   :  { %v2062_v36 = vadd.f32 %v2061_v42, %v4432_v61 }
 0x378   :  { %v2145_v55 = vmax.f32 %v2062_v36, 0.0  ;;  %v1486_v36 = vld [vmem:[%s4647_s4 + $0x3b8] sm:$0xff] }
 0x37a   :  { %v2369_v47 = vmul.f32 %v2236_v6, %v2145_v55  ;;  %2111 = vmatmul.f32.gmra.mxu3 %v1462_v18  ;;  %v2266_v55 = vpop.permute.xlu0 %2265 }
 0x37c   :  { %v2400_v51 = vadd.f32 %v2399_v48, %v2369_v47 }
 0x37d   :  { %v2064_v2 = vpop.f32.mrf.mxu3 }
 0x37e   :  { %v2065_v1 = vadd.f32 %v2064_v2, %v4444_v54  ;;  %v1490_v2 = vld [vmem:[%s4647_s4 + $0x3d8] sm:$0xff] }
 0x380   :  { %v2146_v29 = vmax.f32 %v2065_v1, 0.0 }
 0x382   :  { %v2370_v58 = vmul.f32 %v2241_v23, %v2146_v29  ;;  %2114 = vmatmul.f32.gmra.mxu3 %v1466_v60  ;;  %v2271_v60 = vpop.permute.xlu1 %2270 }
 0x384   :  { %v2401_v61 = vadd.f32 %v2400_v51, %v2370_v58 }
 0x385   :  { %v2067_v3 = vpop.f32.mrf.mxu3 }
 0x386   :  { %v2068_v30 = vadd.f32 %v2067_v3, %v4456_v53 }
 0x388   :  { %v2147_v28 = vmax.f32 %v2068_v30, 0.0  ;;  %v2276_v30 = vpop.permute.xlu2 %2275 }
 0x38a   :  { %v2371_v10 = vmul.f32 %v2246_v38, %v2147_v28  ;;  %2117 = vmatmul.f32.gmra.mxu3 %v1470_v27 }
 0x38c   :  { %v2402_v54 = vadd.f32 %v2401_v61, %v2371_v10  ;;  %v1494_v61 = vld [vmem:[%s4647_s4 + $0x3f8] sm:$0xff] }
 0x38d   :  { %v2070_v13 = vpop.f32.mrf.mxu3 }
 0x38e   :  { %v2071_v56 = vadd.f32 %v2070_v13, %v4468_v43 }
 0x390   :  { %v2148_v8 = vmax.f32 %v2071_v56, 0.0 }
 0x392   :  { %v2372_v59 = vmul.f32 %v2251_v62, %v2148_v8  ;;  %2120 = vmatmul.f32.gmra.mxu3 %v1474_v31  ;;  %v2286_v62 = vpop.permute.xlu1 %2285 }
 0x394   :  { %v2403_v53 = vadd.f32 %v2402_v54, %v2372_v59  ;;  %v2281_v54 = vpop.permute.xlu0 %2280 }
 0x395   :  { %v2073_v24 = vpop.f32.mrf.mxu3 }
 0x396   :  { %v2074_v37 = vadd.f32 %v2073_v24, %v4480_v4 }
 0x398   :  { %v2149_v11 = vmax.f32 %v2074_v37, 0.0 }
 0x39a   :  { %v2373_v14 = vmul.f32 %v2256_v40, %v2149_v11  ;;  %2123 = vmatmul.f32.gmra.mxu3 %v1478_v41  ;;  %v2291_v11 = vpop.permute.xlu2 %2290 }
 0x39c   :  { %v2404_v43 = vadd.f32 %v2403_v53, %v2373_v14 }
 0x39d   :  { %v2076_v12 = vpop.f32.mrf.mxu3 }
 0x39e   :  { %v2077_v57 = vadd.f32 %v2076_v12, %v4492_v34 }
 0x3a0   :  { %v2150_v17 = vmax.f32 %v2077_v57, 0.0 }
 0x3a2   :  { %v2374_v16 = vmul.f32 %v2261_v44, %v2150_v17  ;;  %2126 = vmatmul.f32.gmra.mxu3 %v1482_v22  ;;  %v2296_v22 = vpop.permute.xlu0 %2295 }
 0x3a4   :  { %v2405_v4 = vadd.f32 %v2404_v43, %v2374_v16  ;;  %v1993_v43 = vpop.f32.mrf.mxu2 }
 0x3a5   :  { %v2079_v48 = vpop.f32.mrf.mxu3 }
 0x3a6   :  { %v2080_v42 = vadd.f32 %v2079_v48, %v4504_v39 }
 0x3a8   :  { %v2151_v18 = vmax.f32 %v2080_v42, 0.0  ;;  %v2301_v42 = vpop.permute.xlu1 %2300 }
 0x3aa   :  { %v2375_v6 = vmul.f32 %v2266_v55, %v2151_v18  ;;  %2129 = vmatmul.f32.gmra.mxu3 %v1486_v36 }
 0x3ac   :  { %v2406_v34 = vadd.f32 %v2405_v4, %v2375_v6  ;;  %v1996_v4 = vpop.f32.mrf.mxu2 }
 0x3ad   :  { %v2082_v47 = vpop.f32.mrf.mxu3 }
 0x3ae   :  { %v2083_v51 = vadd.f32 %v2082_v47, %v4516_v20 }
 0x3b0   :  { %v2152_v1 = vmax.f32 %v2083_v51, 0.0 }
 0x3b2   :  { %v2376_v29 = vmul.f32 %v2271_v60, %v2152_v1  ;;  %2132 = vmatmul.f32.gmra.mxu3 %v1490_v2 }
 0x3b4   :  { %v2407_v39 = vadd.f32 %v2406_v34, %v2376_v29  ;;  %v2306_v34 = vpop.permute.xlu2 %2305  ;;  %v1999_v47 = vpop.f32.mrf.mxu2 }
 0x3b5   :  { %v2085_v23 = vpop.f32.mrf.mxu3 }
 0x3b6   :  { %v2086_v58 = vadd.f32 %v2085_v23, %v4528_v50 }
 0x3b8   :  { %v2153_v3 = vmax.f32 %v2086_v58, 0.0  ;;  %v1997_v58 = vadd.f32 %v1996_v4, %v4429_v49 }
 0x3ba   :  { %v2377_v27 = vmul.f32 %v2276_v30, %v2153_v3  ;;  %2135 = vmatmul.f32.gmra.mxu3 %v1494_v61 }
 0x3bc   :  { %v2408_v20 = vadd.f32 %v2407_v39, %v2377_v27  ;;  %v2311_v39 = vpop.permute.xlu0 %2310  ;;  %v2002_v23 = vpop.f32.mrf.mxu2 }
 0x3bd   :  { %v2088_v28 = vpop.f32.mrf.mxu3 }
 0x3be   :  { %v2089_v38 = vadd.f32 %v2088_v28, %v4540_v33  ;;  %v2000_v28 = vadd.f32 %v1999_v47, %v4441_v25 }
 0x3c0   :  { %v2154_v10 = vmax.f32 %v2089_v38, 0.0 }
 0x3c2   :  { %v2378_v13 = vmul.f32 %v2281_v54, %v2154_v10 }
 0x3c4   :  { %v2409_v56 = vadd.f32 %v2408_v20, %v2378_v13  ;;  %v2005_v10 = vpop.f32.mrf.mxu2 }
 0x3c5   :  { %v2091_v31 = vpop.f32.mrf.mxu3 }
 0x3c6   :  { %v2092_v8 = vadd.f32 %v2091_v31, %v4546_v46 }
 0x3c8   :  { %v2155_v50 = vmax.f32 %v2092_v8, 0.0  ;;  %v2003_v8 = vadd.f32 %v2002_v23, %v4453_v15 }
 0x3ca   :  { %v2379_v59 = vmul.f32 %v2286_v62, %v2155_v50 }
 0x3cc   :  { %v2410_v53 = vadd.f32 %v2409_v56, %v2379_v59  ;;  %v2321_v56 = vpop.permute.xlu2 %2320  ;;  %v2008_v59 = vpop.f32.mrf.mxu2 }
 0x3cd   :  { %v2094_v24 = vpop.f32.mrf.mxu3 }
 0x3ce   :  { %v2095_v37 = vadd.f32 %v2094_v24, %v4553_v0  ;;  %v2326_v24 = vpop.permute.xlu0 %2325 }
 0x3d0   :  { %v2156_v41 = vmax.f32 %v2095_v37, 0.0 }
 0x3d2   :  { %v2380_v40 = vmul.f32 %v2291_v11, %v2156_v41  ;;  %v2006_v41 = vadd.f32 %v2005_v10, %v4465_v52 }
 0x3d4   :  { %v2411_v14 = vadd.f32 %v2410_v53, %v2380_v40 }
 0x3d5   :  { %v2097_v33 = vpop.f32.mrf.mxu3 }
 0x3d6   :  { %v2098_v12 = vadd.f32 %v2097_v33, %v4560_v26  ;;  %v1994_v26 = vadd.f32 %v1993_v43, %v4417_v7  ;;  %v2011_v33 = vpop.f32.mrf.mxu2 }
 0x3d8   :  { %v2157_v57 = vmax.f32 %v2098_v12, 0.0 }
 0x3da   :  { %v2381_v17 = vmul.f32 %v2296_v22, %v2157_v57  ;;  %v2009_v57 = vadd.f32 %v2008_v59, %v4477_v35 }
 0x3dc   :  { %v2412_v44 = vadd.f32 %v2411_v14, %v2381_v17 }
 0x3dd   :  { %v2100_v46 = vpop.f32.mrf.mxu3 }
 0x3de   :  { %v2101_v16 = vadd.f32 %v2100_v46, %v4567_v21  ;;  %v2336_v46 = vpop.permute.xlu2 %2335  ;;  %v2014_v4 = vpop.f32.mrf.mxu2 }
 0x3e0   :  { %v2158_v48 = vmax.f32 %v2101_v16, 0.0 }
 0x3e2   :  { %v2382_v36 = vmul.f32 %v2301_v42, %v2158_v48  ;;  %v2012_v48 = vadd.f32 %v2011_v33, %v4489_v9 }
 0x3e4   :  { %v2413_v0 = vadd.f32 %v2412_v44, %v2382_v36 }
 0x3e5   :  { %v2103_v18 = vpop.f32.mrf.mxu3 }
 0x3e6   :  { %v2104_v55 = vadd.f32 %v2103_v18, %v4574_v19  ;;  %v2316_v19 = vpop.permute.xlu1 %2315  ;;  %v2341_v18 = vpop.permute.xlu0 %2340 }
 0x3e7   :  { %v2017_v47 = vpop.f32.mrf.mxu2 }
 0x3e8   :  { %v2159_v6 = vmax.f32 %v2104_v55, 0.0 }
 0x3ea   :  { %v2383_v51 = vmul.f32 %v2306_v34, %v2159_v6  ;;  %v2015_v6 = vadd.f32 %v2014_v4, %v4501_v5 }
 0x3ec   :  { %v2414_v2 = vadd.f32 %v2413_v0, %v2383_v51 }
 0x3ed   :  { %v2106_v1 = vpop.f32.mrf.mxu3 }
 0x3ee   :  { %v2107_v60 = vadd.f32 %v2106_v1, %v1994_v26  ;;  %v2331_v43 = vpop.permute.xlu1 %2330 }
 0x3f0   :  { %v2160_v29 = vmax.f32 %v2107_v60, 0.0  ;;  %v2018_v60 = vadd.f32 %v2017_v47, %v4513_v63 }
 0x3f2   :  { %v2384_v21 = vmul.f32 %v2311_v39, %v2160_v29 }
 0x3f4   :  { %v2415_v61 = vadd.f32 %v2414_v2, %v2384_v21  ;;  %v2020_v21 = vpop.f32.mrf.mxu2 }
 0x3f5   :  { %v2109_v3 = vpop.f32.mrf.mxu3 }
 0x3f6   :  { %v2110_v30 = vadd.f32 %v2109_v3, %v1997_v58  ;;  %v2346_v2 = vpop.permute.xlu1 %2345  ;;  %v2351_v58 = vpop.permute.xlu2 %2350  ;;  %v2021_v3 = vadd.f32 %v2020_v21, %v4525_v32 }
 0x3f8   :  { %v2161_v27 = vmax.f32 %v2110_v30, 0.0 }
 0x3fa   :  { %v2385_v20 = vmul.f32 %v2316_v19, %v2161_v27 }
 0x3fc   :  { %v2416_v38 = vadd.f32 %v2415_v61, %v2385_v20  ;;  %v2356_v20 = vpop.permute.xlu0 %2355 }
 0x3fd   :  { %v2112_v7 = vpop.f32.mrf.mxu3 }
 0x3fe   :  { %v2113_v54 = vadd.f32 %v2112_v7, %v2000_v28  ;;  %v2023_v28 = vpop.f32.mrf.mxu2  ;;  %v2436_v59 = vpop.permute.xlu2 %2435 }
 0x3ff   :  { %v2024_v10 = vadd.f32 %v2023_v28, %v4537_v45 }
 0x400   :  { %v2162_v13 = vmax.f32 %v2113_v54, 0.0 }
 0x402   :  { %v2386_v31 = vmul.f32 %v2321_v56, %v2162_v13  ;;  %v2361_v56 = vpop.permute.xlu1 %2360 }
 0x404   :  { %v2417_v50 = vadd.f32 %v2416_v38, %v2386_v31 }
 0x405   :  { %v2115_v62 = vpop.f32.mrf.mxu3 }
 0x406   :  { %v2116_v49 = vadd.f32 %v2115_v62, %v2003_v8 }
 0x408   :  { %v2163_v53 = vmax.f32 %v2116_v49, 0.0 }
 0x40a   :  { %v2387_v37 = vmul.f32 %v2326_v24, %v2163_v53  ;;  %v2438_v24 = vperm.slane %v2436_v59, 0 }
 0x40c   :  { %v2418_v11 = vadd.f32 %v2417_v50, %v2387_v37 }
 0x40d   :  { %v2118_v25 = vpop.f32.mrf.mxu3 }
 0x40e   :  { %v2119_v40 = vadd.f32 %v2118_v25, %v2006_v41 }
 0x410   :  { %v2164_v14 = vmax.f32 %v2119_v40, 0.0 }
 0x412   :  { %v2388_v12 = vmul.f32 %v2331_v43, %v2164_v14 }
 0x414   :  { %v2419_v22 = vadd.f32 %v2418_v11, %v2388_v12 }
 0x415   :  { %v2121_v15 = vpop.f32.mrf.mxu3 }
 0x416   :  { %v2122_v17 = vadd.f32 %v2121_v15, %v2009_v57 }
 0x418   :  { %v2165_v44 = vmax.f32 %v2122_v17, 0.0 }
 0x41a   :  { %v2389_v16 = vmul.f32 %v2336_v46, %v2165_v44 }
 0x41c   :  { %v2420_v42 = vadd.f32 %v2419_v22, %v2389_v16 }
 0x41d   :  { %v2124_v52 = vpop.f32.mrf.mxu3 }
 0x41e   :  { %v2125_v36 = vadd.f32 %v2124_v52, %v2012_v48 }
 0x420   :  { %v2166_v0 = vmax.f32 %v2125_v36, 0.0 }
 0x422   :  { %v2390_v55 = vmul.f32 %v2341_v18, %v2166_v0 }
 0x424   :  { %v2421_v34 = vadd.f32 %v2420_v42, %v2390_v55 }
 0x425   :  { %v2127_v35 = vpop.f32.mrf.mxu3 }
 0x426   :  { %v2128_v51 = vadd.f32 %v2127_v35, %v2015_v6 }
 0x428   :  { %v2167_v26 = vmax.f32 %v2128_v51, 0.0 }
 0x42a   :  { %v2391_v1 = vmul.f32 %v2346_v2, %v2167_v26 }
 0x42c   :  { %v2422_v29 = vadd.f32 %v2421_v34, %v2391_v1 }
 0x42d   :  { %v2130_v39 = vpop.f32.mrf.mxu3 }
 0x42e   :  { %v2131_v9 = vadd.f32 %v2130_v39, %v2018_v60 }
 0x430   :  { %v2168_v23 = vmax.f32 %v2131_v9, 0.0 }
 0x432   :  { %v2392_v61 = vmul.f32 %v2351_v58, %v2168_v23 }
 0x434   :  { %v2423_v30 = vadd.f32 %v2422_v29, %v2392_v61 }
 0x435   :  { %v2133_v5 = vpop.f32.mrf.mxu3 }
 0x436   :  { %v2134_v27 = vadd.f32 %v2133_v5, %v2021_v3 }
 0x438   :  { %v2169_v19 = vmax.f32 %v2134_v27, 0.0 }
 0x43a   :  { %v2393_v38 = vmul.f32 %v2356_v20, %v2169_v19 }
 0x43c   :  { %v2424_v7 = vadd.f32 %v2423_v30, %v2393_v38 }
 0x43d   :  { %v2136_v63 = vpop.f32.mrf.mxu3 }
 0x43e   :  { %v2137_v54 = vadd.f32 %v2136_v63, %v2024_v10 }
 0x440   :  { %v2170_v13 = vmax.f32 %v2137_v54, 0.0 }
 0x442   :  { %v2394_v31 = vmul.f32 %v2361_v56, %v2170_v13 }
 0x444   :  { %v2425_v8 = vadd.f32 %v2424_v7, %v2394_v31 }
 0x446   :  { %v2426_v50 = vrot.slane %v2425_v8, 4 }
 0x448   :  { %v2427_v62 = vadd.f32 %v2426_v50, %v2425_v8 }
 0x44a   :  { %v2428_v49 = vrot.slane %v2427_v62, 2 }
 0x44c   :  { %v2429_v32 = vadd.f32 %v2428_v49, %v2427_v62 }
 0x44e   :  { %v2430_v53 = vrot.slane %v2429_v32, 1 }
 0x450   :  { %v2431_v37 = vadd.f32 %v2430_v53, %v2429_v32 }
 0x452   :  { %v2439_v41 = vadd.f32 %v2438_v24, %v2431_v37 }
 0x454   :  { %2440 = vst [vmem:[%s4648_s8] sm:$0x1] %v2439_v41 }

</bundles_post_ra>
